<compile_context>
chip_gen: v5e
topology: v5e:2x2
jax: 0.10.0
libtpu: 0.0.40
codegen_flags: <defaults>
</compile_context>

<pallas_src>
import jax
import jax.numpy as jnp
from jax import lax
from jax.experimental import pallas as pl
from jax.experimental.pallas import tpu as pltpu

_LANES = 128
_SUBLANES = 8


def _round_up(v: int, m: int) -> int:
    return ((v + m - 1) // m) * m


def _cdiv(a: int, b: int) -> int:
    return (a + b - 1) // b


def _vmem_capacity_bytes() -> int:
    """Physical VMEM of the local chip; conservative 64 MiB (v7x) fallback."""
    try:
        info = pltpu.get_tpu_info()
        for name in ("vmem_capacity_bytes", "vmem_bytes", "vmem_size_bytes"):
            cap = getattr(info, name, None)
            if cap:
                return int(cap)
    except Exception:
        pass
    return 64 * 1024 * 1024


def _make_kernel(end_token: int, pad_token: int, n_chunks: int, chunk: int,
                 unroll: bool):
    def pooler_kernel(x_ref, src_ref, out_ref, sum_sc, end_sc, cnt_sc, max_sc):
        l = pl.program_id(1)
        nl = pl.num_programs(1)

        x_dtype = x_ref.dtype
        neg_inf_x = jnp.array(-jnp.inf, dtype=x_dtype)
        zero_x = jnp.zeros((), dtype=x_dtype)

        @pl.when(l == 0)
        def _init():
            sum_sc[...] = jnp.zeros_like(sum_sc)
            end_sc[...] = jnp.zeros_like(end_sc)
            cnt_sc[...] = jnp.zeros_like(cnt_sc)
            max_sc[...] = jnp.full_like(max_sc, -jnp.inf)
            # begin = x[0], with -inf where the first token is pad (matches the
            # in-place aliasing in the PyTorch forward).  Written straight into
            # the VMEM-resident output block (its index_map ignores l).
            x0 = x_ref[0]                               # [TB, D]
            pad0 = src_ref[0] == pad_token              # [TB, 1]
            out_ref[0] = jnp.where(pad0, neg_inf_x, x0).astype(out_ref.dtype)

        def chunk_step(c):
            i = c * chunk
            if not isinstance(i, int):
                i = pl.multiple_of(i, chunk)
            xs = x_ref[pl.ds(i, chunk)]                 # [chunk, TB, D], input dtype
            s = src_ref[pl.ds(i, chunk)]                # [chunk, TB, 1] int32
            keep = s != pad_token                       # real (non-pad) tokens
            is_end = s == end_token
            # Selects / running max in the input dtype (cheap bf16 VPU on
            # v6e/v7x); the sum/count accumulators stay f32.  Selects (not
            # multiplies) guarantee that garbage in ragged boundary blocks
            # (including NaN) can never leak into the results.
            sum_sc[...] += jnp.sum(
                jnp.where(keep, xs, zero_x).astype(jnp.float32), axis=0)
            end_sc[...] += jnp.sum(
                jnp.where(is_end, xs, zero_x).astype(jnp.float32), axis=0)
            cnt_sc[...] += jnp.sum(keep.astype(jnp.float32), axis=0)
            max_sc[...] = jnp.maximum(
                max_sc[...], jnp.max(jnp.where(keep, xs, neg_inf_x), axis=0))

        if unroll:
            for c in range(n_chunks):                   # short, statically unrolled
                chunk_step(c)
        else:
            def body(c, carry):
                chunk_step(c)
                return carry
            lax.fori_loop(0, n_chunks, body, 0)

        @pl.when(l == nl - 1)
        def _finalize():
            # Exact reciprocal: runs once per batch tile, precision > speed here.
            inv_cnt = pl.reciprocal(cnt_sc[...], approx=False)      # [TB, 1]
            out_ref[1] = (sum_sc[...] * inv_cnt).astype(out_ref.dtype)
            out_ref[2] = end_sc[...].astype(out_ref.dtype)
            out_ref[3] = max_sc[...].astype(out_ref.dtype)

    return pooler_kernel


def start_mean_end_max_pool(x, src, end_token: int, pad_token: int,
                            *, block_b: int | None = None,
                            block_l: int | None = None):
    """x: [max_len, batch, d_model] float; src: [batch, max_len] int -> [batch, 4*d_model]."""
    L, B, D = x.shape
    out_dtype = x.dtype
    itemsize = jnp.dtype(x.dtype).itemsize

    # ---- batch tile: a multiple of 8 sublanes (or the full batch when B < 8).
    if B < _SUBLANES:
        TB = B                                    # full dim -> exempt from the 8-rule
    elif block_b is not None:
        TB = _round_up(min(max(int(block_b), 1), B), _SUBLANES)
    else:
        # >=2 batch tiles whenever B > 8 so the "parallel" axis can shard across
        # both TensorCores on 2-TC chips (v7x); cap the tile at 64 rows.
        TB = min(64, _round_up(_cdiv(B, 2), _SUBLANES)) if B > _SUBLANES else _SUBLANES
    nb = _cdiv(B, TB)
    Bp = nb * TB

    # ---- per-generation, dtype-aware VMEM budgets. ---------------------------
    vmem_cap = _vmem_capacity_bytes()
    big_vmem = vmem_cap >= 100 * 1024 * 1024          # v5e/v6e: 128 MiB physical
    per_buf_budget = (16 if big_vmem else 10) * 1024 * 1024
    vmem_limit = (64 if big_vmem else 48) * 1024 * 1024

    TBp = _round_up(TB, _SUBLANES)
    Dp_vmem = _round_up(D, _LANES)                    # lane padding (VMEM only; HBM streams D)
    x_row = TBp * Dp_vmem * itemsize                  # x VMEM bytes per L-row, per buffer
    src_row = TBp * _LANES * 4                        # (TB,1) int32 slab lane-pads to 128
    row_bytes = x_row + src_row

    # Inner accumulation chunk: keep per-chunk vector temporaries ~<= 128 KiB.
    chunk = (128 * 1024) // max(x_row, 1)
    chunk = max(_SUBLANES, min(64, (chunk // _SUBLANES) * _SUBLANES))

    if block_l is not None:
        TL = max(chunk, _round_up(int(block_l), chunk))
    else:
        TL = max(chunk, (per_buf_budget // row_bytes) // chunk * chunk)
    TL = min(TL, _round_up(L, chunk))                 # never larger than needed
    nl = _cdiv(L, TL)
    Lp = nl * TL
    n_chunks = TL // chunk
    unroll = n_chunks <= 8

    # ---- wrapper-side plumbing: only the *tiny* src array is padded. ---------
    src_t = jnp.transpose(src, (1, 0)).astype(jnp.int32)                    # [L, B]
    src_p = jnp.pad(src_t, ((0, Lp - L), (0, Bp - B)),
                    constant_values=pad_token)[..., None]                   # [Lp, Bp, 1]

    kernel = _make_kernel(end_token, pad_token, n_chunks, chunk, unroll)

    out_p = pl.pallas_call(
        kernel,
        out_shape=jax.ShapeDtypeStruct((4, Bp, D), out_dtype),
        grid_spec=pltpu.PrefetchScalarGridSpec(
            num_scalar_prefetch=0,
            grid=(nb, nl),
            in_specs=[
                # x streamed un-padded; ragged boundary blocks are masked in-kernel.
                pl.BlockSpec((TL, TB, D), lambda b, l: (l, b, 0)),
                pl.BlockSpec((TL, TB, 1), lambda b, l: (l, b, 0)),
            ],
            out_specs=pl.BlockSpec((4, TB, D), lambda b, l: (0, b, 0)),
            scratch_shapes=[
                pltpu.VMEM((TB, D), jnp.float32),   # sum over non-pad tokens
                pltpu.VMEM((TB, D), jnp.float32),   # sum over end-token positions
                pltpu.VMEM((TB, 1), jnp.float32),   # non-pad token count
                pltpu.VMEM((TB, D), x.dtype),       # running max (exact in input dtype)
            ],
        ),
        compiler_params=pltpu.CompilerParams(
            dimension_semantics=("parallel", "arbitrary"),
            vmem_limit_bytes=vmem_limit,
        ),
    )(x, src_p)

    # (4, Bp, D) -> strip batch padding -> (B, 4*D) in [begin, mean, end, max] order
    # (matches torch.cat([begin, mean, end, max_], dim=1)).
    out = jnp.transpose(out_p[:, :B, :], (1, 0, 2)).reshape(B, 4 * D)
    return out


def _reference(x, src, end_token, pad_token):
    # Pure-JAX mirror of the PyTorch forward (incl. the in-place aliasing of begin).
    src_t = jnp.transpose(src, (1, 0))                                       # [L, B]
    end = jnp.sum(x * (src_t == end_token)[..., None].astype(x.dtype), axis=0)
    pad_mask = (src_t != pad_token).astype(x.dtype)
    mean = jnp.sum(x * pad_mask[..., None], axis=0) / jnp.sum(pad_mask, axis=0)[:, None]
    x_masked = jnp.where((src_t == pad_token)[..., None], -jnp.inf, x)
    begin = x_masked[0]          # == x[0] with -inf where the first token is pad
    max_ = jnp.max(x_masked, axis=0)
    return jnp.concatenate([begin, mean, end, max_], axis=1)


if __name__ == "__main__":
    END_TOKEN = 2
    PAD_TOKEN = 0

    # Small but boundary-exercising shapes: L not a multiple of 8, B not a
    # multiple of 8, D not a multiple of 128 -> every ragged path is covered.
    L, B, D = 22, 10, 160

    key = jax.random.PRNGKey(0)
    x = jax.random.normal(key, (L, B, D), dtype=jnp.float32)

    # src: [batch, max_len] — real tokens (ids 3..9), one end_token, then padding.
    lens = [5, 12, 22, 1, 8, 17, 3, 20, 22, 9]
    rows = []
    for i, n in enumerate(lens):
        toks = [3 + ((i + j) % 7) for j in range(n - 1)] + [END_TOKEN]
        toks = toks + [PAD_TOKEN] * (L - n)
        rows.append(toks)
    src = jnp.array(rows, dtype=jnp.int32)          # [B, L]

    ref = _reference(x, src, END_TOKEN, PAD_TOKEN)

    # 1) auto-tiled config (budget-driven TL / TB, >=2 batch tiles).
    out_a = jax.block_until_ready(
        start_mean_end_max_pool(x, src, END_TOKEN, PAD_TOKEN))
    # 2) small explicit tiles: multiple L tiles + a batch tile overhanging B.
    out_b = jax.block_until_ready(
        start_mean_end_max_pool(x, src, END_TOKEN, PAD_TOKEN,
                                block_b=16, block_l=8))

    for out in (out_a, out_b):
        assert out.shape == (B, 4 * D), out.shape
        assert jnp.allclose(out, ref, atol=1e-5, rtol=1e-5), "mismatch vs reference"

    print("KERNEL_OK")
</pallas_src>

<mosaic_0001>
module attributes {stable_mosaic.version = 11 : i64} {
  func.func @pooler_kernel(%arg0: i32, %arg1: i32, %arg2: memref<32x8x160xf32, #tpu.memory_space<vmem>>, %arg3: memref<32x8x1xi32, #tpu.memory_space<vmem>>, %arg4: memref<4x8x160xf32, #tpu.memory_space<vmem>>, %arg5: memref<8x160xf32, #tpu.memory_space<vmem>>, %arg6: memref<8x160xf32, #tpu.memory_space<vmem>>, %arg7: memref<8x1xf32, #tpu.memory_space<vmem>>, %arg8: memref<8x160xf32, #tpu.memory_space<vmem>>) attributes {dimension_semantics = [#tpu.dimension_semantics<parallel>, #tpu.dimension_semantics<arbitrary>], iteration_bounds = array<i64: 2, 1>, scalar_prefetch = 0 : i64, scratch_operands = 4 : i64, tpu.core_type = #tpu.core_type<tc>, window_params = [{transform_indices = @transform_0, window_bounds = array<i64: 32, 8, 160>}, {transform_indices = @transform_1, window_bounds = array<i64: 32, 8, 1>}, {transform_indices = @transform_2, window_bounds = array<i64: 4, 8, 160>}]} {
    %c0_i32 = arith.constant 0 : i32
    %0 = arith.cmpi eq, %arg1, %c0_i32 : i32
    %1 = arith.extui %0 : i1 to i32
    %cst = arith.constant 0xFF800000 : f32
    %c0_i32_0 = arith.constant 0 : i32
    %2 = arith.cmpi ne, %1, %c0_i32_0 : i32
    scf.if %2 {
      %cst_62 = arith.constant 0.000000e+00 : f32
      %78 = vector.broadcast %cst_62 : f32 to vector<8x160xf32>
      %c0_63 = arith.constant 0 : index
      %c0_64 = arith.constant 0 : index
      %79 = vector.load %arg5[%c0_63, %c0_64] : memref<8x160xf32, #tpu.memory_space<vmem>>, vector<8x160xf32>
      tpu.vector_store %arg5[%c0_63, %c0_64], %78 {strides = array<i32>} : memref<8x160xf32, #tpu.memory_space<vmem>>, vector<8x160xf32>,
      %cst_65 = arith.constant 0.000000e+00 : f32
      %80 = vector.broadcast %cst_65 : f32 to vector<8x160xf32>
      %c0_66 = arith.constant 0 : index
      %c0_67 = arith.constant 0 : index
      %81 = vector.load %arg6[%c0_66, %c0_67] : memref<8x160xf32, #tpu.memory_space<vmem>>, vector<8x160xf32>
      tpu.vector_store %arg6[%c0_66, %c0_67], %80 {strides = array<i32>} : memref<8x160xf32, #tpu.memory_space<vmem>>, vector<8x160xf32>,
      %cst_68 = arith.constant 0.000000e+00 : f32
      %82 = vector.broadcast %cst_68 : f32 to vector<8x1xf32>
      %c0_69 = arith.constant 0 : index
      %c0_70 = arith.constant 0 : index
      %83 = vector.load %arg7[%c0_69, %c0_70] : memref<8x1xf32, #tpu.memory_space<vmem>>, vector<8x1xf32>
      tpu.vector_store %arg7[%c0_69, %c0_70], %82 {strides = array<i32>} : memref<8x1xf32, #tpu.memory_space<vmem>>, vector<8x1xf32>,
      %cst_71 = arith.constant 0xFF800000 : f32
      %84 = vector.broadcast %cst_71 : f32 to vector<8x160xf32>
      %c0_72 = arith.constant 0 : index
      %c0_73 = arith.constant 0 : index
      %85 = vector.load %arg8[%c0_72, %c0_73] : memref<8x160xf32, #tpu.memory_space<vmem>>, vector<8x160xf32>
      tpu.vector_store %arg8[%c0_72, %c0_73], %84 {strides = array<i32>} : memref<8x160xf32, #tpu.memory_space<vmem>>, vector<8x160xf32>,
      %c0_74 = arith.constant 0 : index
      %c0_75 = arith.constant 0 : index
      %c0_76 = arith.constant 0 : index
      %86 = vector.load %arg2[%c0_74, %c0_75, %c0_76] : memref<32x8x160xf32, #tpu.memory_space<vmem>>, vector<1x8x160xf32>
      %87 = vector.shape_cast %86 : vector<1x8x160xf32> to vector<8x160xf32>
      %c0_77 = arith.constant 0 : index
      %c0_78 = arith.constant 0 : index
      %c0_79 = arith.constant 0 : index
      %88 = vector.load %arg3[%c0_77, %c0_78, %c0_79] : memref<32x8x1xi32, #tpu.memory_space<vmem>>, vector<1x8x1xi32>
      %89 = vector.shape_cast %88 : vector<1x8x1xi32> to vector<8x1xi32>
      %c0_i32_80 = arith.constant 0 : i32
      %90 = vector.broadcast %c0_i32_80 : i32 to vector<8x1xi32>
      %91 = arith.cmpi eq, %89, %90 : vector<8x1xi32>
      %92 = vector.shape_cast %91 : vector<8x1xi1> to vector<8x1xi1>
      %93 = vector.broadcast %92 : vector<8x1xi1> to vector<8x160xi1>
      %94 = vector.broadcast %cst : f32 to vector<8x160xf32>
      %95 = arith.select %93, %94, %87 : vector<8x160xi1>, vector<8x160xf32>
      %c0_81 = arith.constant 0 : index
      %c0_82 = arith.constant 0 : index
      %c0_83 = arith.constant 0 : index
      %96 = vector.load %arg4[%c0_81, %c0_82, %c0_83] : memref<4x8x160xf32, #tpu.memory_space<vmem>>, vector<1x8x160xf32>
      %97 = vector.shape_cast %96 : vector<1x8x160xf32> to vector<8x160xf32>
      %98 = vector.shape_cast %95 : vector<8x160xf32> to vector<1x8x160xf32>
      tpu.vector_store %arg4[%c0_81, %c0_82, %c0_83], %98 {strides = array<i32>} : memref<4x8x160xf32, #tpu.memory_space<vmem>>, vector<1x8x160xf32>,
    } else {
    }
    %c0 = arith.constant 0 : index
    %c0_1 = arith.constant 0 : index
    %c0_2 = arith.constant 0 : index
    %3 = vector.load %arg2[%c0, %c0_1, %c0_2] : memref<32x8x160xf32, #tpu.memory_space<vmem>>, vector<16x8x160xf32>
    %c0_3 = arith.constant 0 : index
    %c0_4 = arith.constant 0 : index
    %c0_5 = arith.constant 0 : index
    %4 = vector.load %arg3[%c0_3, %c0_4, %c0_5] : memref<32x8x1xi32, #tpu.memory_space<vmem>>, vector<16x8x1xi32>
    %c0_i32_6 = arith.constant 0 : i32
    %5 = vector.broadcast %c0_i32_6 : i32 to vector<16x8x1xi32>
    %6 = arith.cmpi ne, %4, %5 : vector<16x8x1xi32>
    %c2_i32 = arith.constant 2 : i32
    %7 = vector.broadcast %c2_i32 : i32 to vector<16x8x1xi32>
    %8 = arith.cmpi eq, %4, %7 : vector<16x8x1xi32>
    %c0_7 = arith.constant 0 : index
    %c0_8 = arith.constant 0 : index
    %9 = vector.load %arg5[%c0_7, %c0_8] : memref<8x160xf32, #tpu.memory_space<vmem>>, vector<8x160xf32>
    %cst_9 = arith.constant 0.000000e+00 : f32
    %10 = vector.shape_cast %6 : vector<16x8x1xi1> to vector<16x8x1xi1>
    %11 = vector.broadcast %10 : vector<16x8x1xi1> to vector<16x8x160xi1>
    %12 = vector.broadcast %cst_9 : f32 to vector<16x8x160xf32>
    %13 = arith.select %11, %3, %12 : vector<16x8x160xi1>, vector<16x8x160xf32>
    %cst_10 = arith.constant dense<0.000000e+00> : vector<8x160xf32>
    %14 = vector.multi_reduction <add>, %13, %cst_10 [0] : vector<16x8x160xf32> to vector<8x160xf32>
    %15 = arith.addf %9, %14 : vector<8x160xf32>
    %c0_11 = arith.constant 0 : index
    %c0_12 = arith.constant 0 : index
    %16 = vector.load %arg5[%c0_11, %c0_12] : memref<8x160xf32, #tpu.memory_space<vmem>>, vector<8x160xf32>
    tpu.vector_store %arg5[%c0_11, %c0_12], %15 {strides = array<i32>} : memref<8x160xf32, #tpu.memory_space<vmem>>, vector<8x160xf32>,
    %c0_13 = arith.constant 0 : index
    %c0_14 = arith.constant 0 : index
    %17 = vector.load %arg6[%c0_13, %c0_14] : memref<8x160xf32, #tpu.memory_space<vmem>>, vector<8x160xf32>
    %cst_15 = arith.constant 0.000000e+00 : f32
    %18 = vector.shape_cast %8 : vector<16x8x1xi1> to vector<16x8x1xi1>
    %19 = vector.broadcast %18 : vector<16x8x1xi1> to vector<16x8x160xi1>
    %20 = vector.broadcast %cst_15 : f32 to vector<16x8x160xf32>
    %21 = arith.select %19, %3, %20 : vector<16x8x160xi1>, vector<16x8x160xf32>
    %cst_16 = arith.constant dense<0.000000e+00> : vector<8x160xf32>
    %22 = vector.multi_reduction <add>, %21, %cst_16 [0] : vector<16x8x160xf32> to vector<8x160xf32>
    %23 = arith.addf %17, %22 : vector<8x160xf32>
    %c0_17 = arith.constant 0 : index
    %c0_18 = arith.constant 0 : index
    %24 = vector.load %arg6[%c0_17, %c0_18] : memref<8x160xf32, #tpu.memory_space<vmem>>, vector<8x160xf32>
    tpu.vector_store %arg6[%c0_17, %c0_18], %23 {strides = array<i32>} : memref<8x160xf32, #tpu.memory_space<vmem>>, vector<8x160xf32>,
    %c0_19 = arith.constant 0 : index
    %c0_20 = arith.constant 0 : index
    %25 = vector.load %arg7[%c0_19, %c0_20] : memref<8x1xf32, #tpu.memory_space<vmem>>, vector<8x1xf32>
    %26 = arith.extui %6 : vector<16x8x1xi1> to vector<16x8x1xi32>
    %27 = arith.sitofp %26 : vector<16x8x1xi32> to vector<16x8x1xf32>
    %cst_21 = arith.constant dense<0.000000e+00> : vector<8x1xf32>
    %28 = vector.multi_reduction <add>, %27, %cst_21 [0] : vector<16x8x1xf32> to vector<8x1xf32>
    %29 = arith.addf %25, %28 : vector<8x1xf32>
    %c0_22 = arith.constant 0 : index
    %c0_23 = arith.constant 0 : index
    %30 = vector.load %arg7[%c0_22, %c0_23] : memref<8x1xf32, #tpu.memory_space<vmem>>, vector<8x1xf32>
    tpu.vector_store %arg7[%c0_22, %c0_23], %29 {strides = array<i32>} : memref<8x1xf32, #tpu.memory_space<vmem>>, vector<8x1xf32>,
    %c0_24 = arith.constant 0 : index
    %c0_25 = arith.constant 0 : index
    %31 = vector.load %arg8[%c0_24, %c0_25] : memref<8x160xf32, #tpu.memory_space<vmem>>, vector<8x160xf32>
    %cst_26 = arith.constant 0xFF800000 : f32
    %32 = vector.shape_cast %6 : vector<16x8x1xi1> to vector<16x8x1xi1>
    %33 = vector.broadcast %32 : vector<16x8x1xi1> to vector<16x8x160xi1>
    %34 = vector.broadcast %cst_26 : f32 to vector<16x8x160xf32>
    %35 = arith.select %33, %3, %34 : vector<16x8x160xi1>, vector<16x8x160xf32>
    %cst_27 = arith.constant dense<0xFF800000> : vector<8x160xf32>
    %36 = vector.multi_reduction <maximumf>, %35, %cst_27 [0] : vector<16x8x160xf32> to vector<8x160xf32>
    %37 = arith.maximumf %31, %36 : vector<8x160xf32>
    %c0_28 = arith.constant 0 : index
    %c0_29 = arith.constant 0 : index
    %38 = vector.load %arg8[%c0_28, %c0_29] : memref<8x160xf32, #tpu.memory_space<vmem>>, vector<8x160xf32>
    tpu.vector_store %arg8[%c0_28, %c0_29], %37 {strides = array<i32>} : memref<8x160xf32, #tpu.memory_space<vmem>>, vector<8x160xf32>,
    %c16 = arith.constant 16 : index
    %c0_30 = arith.constant 0 : index
    %c0_31 = arith.constant 0 : index
    %39 = vector.load %arg2[%c16, %c0_30, %c0_31] : memref<32x8x160xf32, #tpu.memory_space<vmem>>, vector<16x8x160xf32>
    %c16_32 = arith.constant 16 : index
    %c0_33 = arith.constant 0 : index
    %c0_34 = arith.constant 0 : index
    %40 = vector.load %arg3[%c16_32, %c0_33, %c0_34] : memref<32x8x1xi32, #tpu.memory_space<vmem>>, vector<16x8x1xi32>
    %c0_i32_35 = arith.constant 0 : i32
    %41 = vector.broadcast %c0_i32_35 : i32 to vector<16x8x1xi32>
    %42 = arith.cmpi ne, %40, %41 : vector<16x8x1xi32>
    %c2_i32_36 = arith.constant 2 : i32
    %43 = vector.broadcast %c2_i32_36 : i32 to vector<16x8x1xi32>
    %44 = arith.cmpi eq, %40, %43 : vector<16x8x1xi32>
    %c0_37 = arith.constant 0 : index
    %c0_38 = arith.constant 0 : index
    %45 = vector.load %arg5[%c0_37, %c0_38] : memref<8x160xf32, #tpu.memory_space<vmem>>, vector<8x160xf32>
    %cst_39 = arith.constant 0.000000e+00 : f32
    %46 = vector.shape_cast %42 : vector<16x8x1xi1> to vector<16x8x1xi1>
    %47 = vector.broadcast %46 : vector<16x8x1xi1> to vector<16x8x160xi1>
    %48 = vector.broadcast %cst_39 : f32 to vector<16x8x160xf32>
    %49 = arith.select %47, %39, %48 : vector<16x8x160xi1>, vector<16x8x160xf32>
    %cst_40 = arith.constant dense<0.000000e+00> : vector<8x160xf32>
    %50 = vector.multi_reduction <add>, %49, %cst_40 [0] : vector<16x8x160xf32> to vector<8x160xf32>
    %51 = arith.addf %45, %50 : vector<8x160xf32>
    %c0_41 = arith.constant 0 : index
    %c0_42 = arith.constant 0 : index
    %52 = vector.load %arg5[%c0_41, %c0_42] : memref<8x160xf32, #tpu.memory_space<vmem>>, vector<8x160xf32>
    tpu.vector_store %arg5[%c0_41, %c0_42], %51 {strides = array<i32>} : memref<8x160xf32, #tpu.memory_space<vmem>>, vector<8x160xf32>,
    %c0_43 = arith.constant 0 : index
    %c0_44 = arith.constant 0 : index
    %53 = vector.load %arg6[%c0_43, %c0_44] : memref<8x160xf32, #tpu.memory_space<vmem>>, vector<8x160xf32>
    %cst_45 = arith.constant 0.000000e+00 : f32
    %54 = vector.shape_cast %44 : vector<16x8x1xi1> to vector<16x8x1xi1>
    %55 = vector.broadcast %54 : vector<16x8x1xi1> to vector<16x8x160xi1>
    %56 = vector.broadcast %cst_45 : f32 to vector<16x8x160xf32>
    %57 = arith.select %55, %39, %56 : vector<16x8x160xi1>, vector<16x8x160xf32>
    %cst_46 = arith.constant dense<0.000000e+00> : vector<8x160xf32>
    %58 = vector.multi_reduction <add>, %57, %cst_46 [0] : vector<16x8x160xf32> to vector<8x160xf32>
    %59 = arith.addf %53, %58 : vector<8x160xf32>
    %c0_47 = arith.constant 0 : index
    %c0_48 = arith.constant 0 : index
    %60 = vector.load %arg6[%c0_47, %c0_48] : memref<8x160xf32, #tpu.memory_space<vmem>>, vector<8x160xf32>
    tpu.vector_store %arg6[%c0_47, %c0_48], %59 {strides = array<i32>} : memref<8x160xf32, #tpu.memory_space<vmem>>, vector<8x160xf32>,
    %c0_49 = arith.constant 0 : index
    %c0_50 = arith.constant 0 : index
    %61 = vector.load %arg7[%c0_49, %c0_50] : memref<8x1xf32, #tpu.memory_space<vmem>>, vector<8x1xf32>
    %62 = arith.extui %42 : vector<16x8x1xi1> to vector<16x8x1xi32>
    %63 = arith.sitofp %62 : vector<16x8x1xi32> to vector<16x8x1xf32>
    %cst_51 = arith.constant dense<0.000000e+00> : vector<8x1xf32>
    %64 = vector.multi_reduction <add>, %63, %cst_51 [0] : vector<16x8x1xf32> to vector<8x1xf32>
    %65 = arith.addf %61, %64 : vector<8x1xf32>
    %c0_52 = arith.constant 0 : index
    %c0_53 = arith.constant 0 : index
    %66 = vector.load %arg7[%c0_52, %c0_53] : memref<8x1xf32, #tpu.memory_space<vmem>>, vector<8x1xf32>
    tpu.vector_store %arg7[%c0_52, %c0_53], %65 {strides = array<i32>} : memref<8x1xf32, #tpu.memory_space<vmem>>, vector<8x1xf32>,
    %c0_54 = arith.constant 0 : index
    %c0_55 = arith.constant 0 : index
    %67 = vector.load %arg8[%c0_54, %c0_55] : memref<8x160xf32, #tpu.memory_space<vmem>>, vector<8x160xf32>
    %cst_56 = arith.constant 0xFF800000 : f32
    %68 = vector.shape_cast %42 : vector<16x8x1xi1> to vector<16x8x1xi1>
    %69 = vector.broadcast %68 : vector<16x8x1xi1> to vector<16x8x160xi1>
    %70 = vector.broadcast %cst_56 : f32 to vector<16x8x160xf32>
    %71 = arith.select %69, %39, %70 : vector<16x8x160xi1>, vector<16x8x160xf32>
    %cst_57 = arith.constant dense<0xFF800000> : vector<8x160xf32>
    %72 = vector.multi_reduction <maximumf>, %71, %cst_57 [0] : vector<16x8x160xf32> to vector<8x160xf32>
    %73 = arith.maximumf %67, %72 : vector<8x160xf32>
    %c0_58 = arith.constant 0 : index
    %c0_59 = arith.constant 0 : index
    %74 = vector.load %arg8[%c0_58, %c0_59] : memref<8x160xf32, #tpu.memory_space<vmem>>, vector<8x160xf32>
    tpu.vector_store %arg8[%c0_58, %c0_59], %73 {strides = array<i32>} : memref<8x160xf32, #tpu.memory_space<vmem>>, vector<8x160xf32>,
    %c0_i32_60 = arith.constant 0 : i32
    %75 = arith.cmpi eq, %arg1, %c0_i32_60 : i32
    %76 = arith.extui %75 : i1 to i32
    %c0_i32_61 = arith.constant 0 : i32
    %77 = arith.cmpi ne, %76, %c0_i32_61 : i32
    scf.if %77 {
      %c0_62 = arith.constant 0 : index
      %c0_63 = arith.constant 0 : index
      %78 = vector.load %arg7[%c0_62, %c0_63] : memref<8x1xf32, #tpu.memory_space<vmem>>, vector<8x1xf32>
      %79 = tpu.reciprocal %78 : vector<8x1xf32> -> vector<8x1xf32>
      %c0_64 = arith.constant 0 : index
      %c0_65 = arith.constant 0 : index
      %80 = vector.load %arg5[%c0_64, %c0_65] : memref<8x160xf32, #tpu.memory_space<vmem>>, vector<8x160xf32>
      %81 = vector.broadcast %79 : vector<8x1xf32> to vector<8x160xf32>
      %82 = arith.mulf %80, %81 : vector<8x160xf32>
      %c1 = arith.constant 1 : index
      %c0_66 = arith.constant 0 : index
      %c0_67 = arith.constant 0 : index
      %83 = vector.load %arg4[%c1, %c0_66, %c0_67] : memref<4x8x160xf32, #tpu.memory_space<vmem>>, vector<1x8x160xf32>
      %84 = vector.shape_cast %83 : vector<1x8x160xf32> to vector<8x160xf32>
      %85 = vector.shape_cast %82 : vector<8x160xf32> to vector<1x8x160xf32>
      tpu.vector_store %arg4[%c1, %c0_66, %c0_67], %85 {strides = array<i32>} : memref<4x8x160xf32, #tpu.memory_space<vmem>>, vector<1x8x160xf32>,
      %c0_68 = arith.constant 0 : index
      %c0_69 = arith.constant 0 : index
      %86 = vector.load %arg6[%c0_68, %c0_69] : memref<8x160xf32, #tpu.memory_space<vmem>>, vector<8x160xf32>
      %c2 = arith.constant 2 : index
      %c0_70 = arith.constant 0 : index
      %c0_71 = arith.constant 0 : index
      %87 = vector.load %arg4[%c2, %c0_70, %c0_71] : memref<4x8x160xf32, #tpu.memory_space<vmem>>, vector<1x8x160xf32>
      %88 = vector.shape_cast %87 : vector<1x8x160xf32> to vector<8x160xf32>
      %89 = vector.shape_cast %86 : vector<8x160xf32> to vector<1x8x160xf32>
      tpu.vector_store %arg4[%c2, %c0_70, %c0_71], %89 {strides = array<i32>} : memref<4x8x160xf32, #tpu.memory_space<vmem>>, vector<1x8x160xf32>,
      %c0_72 = arith.constant 0 : index
      %c0_73 = arith.constant 0 : index
      %90 = vector.load %arg8[%c0_72, %c0_73] : memref<8x160xf32, #tpu.memory_space<vmem>>, vector<8x160xf32>
      %c3 = arith.constant 3 : index
      %c0_74 = arith.constant 0 : index
      %c0_75 = arith.constant 0 : index
      %91 = vector.load %arg4[%c3, %c0_74, %c0_75] : memref<4x8x160xf32, #tpu.memory_space<vmem>>, vector<1x8x160xf32>
      %92 = vector.shape_cast %91 : vector<1x8x160xf32> to vector<8x160xf32>
      %93 = vector.shape_cast %90 : vector<8x160xf32> to vector<1x8x160xf32>
      tpu.vector_store %arg4[%c3, %c0_74, %c0_75], %93 {strides = array<i32>} : memref<4x8x160xf32, #tpu.memory_space<vmem>>, vector<1x8x160xf32>,
    } else {
    }
    return
  }
  func.func @transform_0(%arg0: i32, %arg1: i32) -> (i32, i32, i32) {
    %c0_i32 = arith.constant 0 : i32
    %c0_i32_0 = arith.constant 0 : i32
    return %arg1, %arg0, %c0_i32 : i32, i32, i32
  }
  func.func @transform_1(%arg0: i32, %arg1: i32) -> (i32, i32, i32) {
    %c0_i32 = arith.constant 0 : i32
    %c0_i32_0 = arith.constant 0 : i32
    return %arg1, %arg0, %c0_i32 : i32, i32, i32
  }
  func.func @transform_2(%arg0: i32, %arg1: i32) -> (i32, i32, i32) {
    %c0_i32 = arith.constant 0 : i32
    %c0_i32_0 = arith.constant 0 : i32
    %c0_i32_1 = arith.constant 0 : i32
    return %c0_i32, %arg0, %c0_i32_0 : i32, i32, i32
  }
}

</mosaic_0001>

<bundles_post_ra>
// kernel: tpu_custom_call.1
= control target key start
LH: loop header
LB: loop body
LE: loop exit
PB: predicated region body
PF: predicated region fallthrough
CT: control target
= control target key end

     0   :  { %7 = vsyncpa [#allocation9], 0  ;;  %s3978_s0 = inlined_call_operand.vmem [shape: f32[22,10,160], index: 0, kind: input, shape index: {}]   ;;  %s3979_s1 = inlined_call_operand.vmem [shape: s32[32,16,1], index: 1, kind: input, shape index: {}]   ;;  %s3980_s2 = inlined_call_operand.hbm [shape: f32[4,16,160], index: 2, kind: output, shape index: {}]  }
   0x1   :  { %9 = vsyncpa [#allocation9 + $0x1], 0  ;;  %s2173_s9 = smov 0   ;;  %s2175_s10 = smov 0  }
   0x2   :  { %s2177_s11 = smov 0   ;;  %s2179_s12 = smov 0  }
   0x3   :  { %s2181_s13 = smov 0   ;;  %s2183_s14 = smov 0  }
   0x4 LB: > { %s1776_s15 = sadd.s32 4294967295, %s2130_s14   ;;  %s1777_s16 = sadd.s32 4294967294, %s2130_s14   ;;  %s2130_s14 = sphi %s2183_s14, %s15_s14   ;;  %s2126_s13 = sphi %s2181_s13, %s4049_s13   ;;  %s2122_s12 = sphi %s2179_s12, %s4048_s12   ;;  %s2118_s11 = sphi %s2177_s11, %s4047_s11   ;;  %s2114_s10 = sphi %s2175_s10, %s4046_s10   ;;  %s2110_s9 = sphi %s2173_s9, %s4045_s9  }
   0x5   : > { %s27_s17 = sadd.s32 1, %s2126_s13  ;;  %s36_s18 = sadd.s32 1, %s2118_s11 }
   0x6   : > { %p29_p0 = scmp.ge.s32.totalorder %s27_s17, 2  ;;  %p43_p1 = scmp.ne.s32.totalorder %s2118_s11, %s2114_s10 }
   0x7   : > { %p44_p2 = scmp.eq.s32.totalorder %s2130_s14, 0  ;;  %p101_p3 = scmp.eq.s32.totalorder %s1776_s15, 1 }
   0x8   : > { %s4051_s17 = smov (%p29_p0, %s27_s17), 0  ;;  %p106_p6 = scmp.ne.s32.totalorder %s2114_s10, %s2110_s9 }
   0x9   : > { %p2212_p4 = por %p44_p2, %p43_p1  ;;  %p2216_p5 = por %p101_p3, %p43_p1 }
   0xa   : > { %s32_s21 = ssub.s32 %s2126_s13, %s4051_s17  ;;  %p107_p8 = scmp.eq.s32.totalorder %s1777_s16, 1 }
   0xb   : > { %p34_p7 = scmp.eq.s32.totalorder %s32_s21, 0  ;;  %p1779_p10 = scmp.ge.s32.totalorder %s2130_s14, 2 }
   0xc   : > { %p2227_p9 = por %p107_p8, %p106_p6 }
   0xd   : > { %s2225_s22 = scalar_select %p34_p7, %s2118_s11, %s36_s18  }
   0xe   : > { %123 = sbr.rel (%p1779_p10) target bundleno = 101 (0x65), region = 16 }
  0x13   : > { %126 = sbr.rel (!%p2212_p4) target bundleno = 65 (0x41), region = 20  ;;  %s128_s24 = sand.u32 (%p2212_p4), 1, %s2118_s11  }
  0x14   : > { %s1888_s25 = sshll.u32 (%p2212_p4), %s2126_s13, 4  ;;  %s1780_s26 = sshll.u32 (%p2212_p4), %s128_s24, 9 }
  0x15   : > { %s2241_s29 = scalar_lea.vmem (%p2212_p4), %s3978_s0, %s1888_s25   ;;  %s2243_s30 = scalar_lea.vmem (%p2212_p4), [#allocation6], %s1780_s26  }
  0x16   : > { %s2245_s3 = smov (%p2212_p4), 0  }
  0x18 LB: >> { %v156_v0 = vld [vmem:[%s2241_s29] sm:$0xff]  ;;  %v188_v16 = vld [vmem:[%s2241_s29 + $0x8] sm:$0xff]  ;;  %s150_s3 = sadd.s32 1, %s2134_s3   ;;  %s2134_s3 = sphi %s2245_s3, %s150_s3  }
  0x19   : >> { %v158_v1 = vld [vmem:[%s2241_s29 + $0x20] sm:$0xff]  ;;  %157 = vst [vmem:[%s2243_s30] sm:$0xff] %v156_v0  ;;  %v190_v17 = vld [vmem:[%s2241_s29 + $0x28] sm:$0xff]  ;;  %p149_p11 = scmp.ge.s32.totalorder %s150_s3, 1 }
  0x1a   : >> { %v160_v2 = vld [vmem:[%s2241_s29 + $0x40] sm:$0xff]  ;;  %159 = vst [vmem:[%s2243_s30 + $0x10] sm:$0xff] %v158_v1  ;;  %v192_v18 = vld [vmem:[%s2241_s29 + $0x48] sm:$0xff]  ;;  %s231_s4 = scalar_lea.vmem (%p149_p11), %s2241_s29, 512   ;;  %s233_s5 = scalar_lea.vmem (%p149_p11), %s2243_s30, 256 [#allocation6]  }
  0x1b   : >> { %v162_v3 = vld [vmem:[%s2241_s29 + $0x60] sm:$0xff]  ;;  %161 = vst [vmem:[%s2243_s30 + $0x20] sm:$0xff] %v160_v2  ;;  %v194_v19 = vld [vmem:[%s2241_s29 + $0x68] sm:$0xff]  ;;  %s2140_s6 = smov (%p149_p11), %s231_s4   ;;  %s2144_s7 = smov (%p149_p11), 0  }
  0x1c   : >> { %v164_v4 = vld [vmem:[%s2241_s29 + $0x80] sm:$0xff]  ;;  %163 = vst [vmem:[%s2243_s30 + $0x30] sm:$0xff] %v162_v3  ;;  %v196_v20 = vld [vmem:[%s2241_s29 + $0x88] sm:$0xff]  ;;  %s2148_s8 = smov (%p149_p11), 0  }
  0x1d   : >> { %v166_v5 = vld [vmem:[%s2241_s29 + $0xa0] sm:$0xff]  ;;  %165 = vst [vmem:[%s2243_s30 + $0x40] sm:$0xff] %v164_v4  ;;  %v198_v21 = vld [vmem:[%s2241_s29 + $0xa8] sm:$0xff] }
  0x1e   : >> { %v168_v6 = vld [vmem:[%s2241_s29 + $0xc0] sm:$0xff]  ;;  %167 = vst [vmem:[%s2243_s30 + $0x50] sm:$0xff] %v166_v5  ;;  %v200_v22 = vld [vmem:[%s2241_s29 + $0xc8] sm:$0xff] }
  0x1f   : >> { %v170_v7 = vld [vmem:[%s2241_s29 + $0xe0] sm:$0xff]  ;;  %169 = vst [vmem:[%s2243_s30 + $0x60] sm:$0xff] %v168_v6  ;;  %v202_v23 = vld [vmem:[%s2241_s29 + $0xe8] sm:$0xff] }
  0x20   : >> { %v172_v8 = vld [vmem:[%s2241_s29 + $0x100] sm:$0xff]  ;;  %171 = vst [vmem:[%s2243_s30 + $0x70] sm:$0xff] %v170_v7  ;;  %v204_v24 = vld [vmem:[%s2241_s29 + $0x108] sm:$0xff] }
  0x21   : >> { %v174_v9 = vld [vmem:[%s2241_s29 + $0x120] sm:$0xff]  ;;  %173 = vst [vmem:[%s2243_s30 + $0x80] sm:$0xff] %v172_v8  ;;  %v206_v25 = vld [vmem:[%s2241_s29 + $0x128] sm:$0xff] }
  0x22   : >> { %v176_v10 = vld [vmem:[%s2241_s29 + $0x140] sm:$0xff]  ;;  %175 = vst [vmem:[%s2243_s30 + $0x90] sm:$0xff] %v174_v9  ;;  %v208_v26 = vld [vmem:[%s2241_s29 + $0x148] sm:$0xff] }
  0x23   : >> { %v178_v11 = vld [vmem:[%s2241_s29 + $0x160] sm:$0xff]  ;;  %177 = vst [vmem:[%s2243_s30 + $0xa0] sm:$0xff] %v176_v10  ;;  %v210_v27 = vld [vmem:[%s2241_s29 + $0x168] sm:$0xff] }
  0x24   : >> { %v180_v12 = vld [vmem:[%s2241_s29 + $0x180] sm:$0xff]  ;;  %179 = vst [vmem:[%s2243_s30 + $0xb0] sm:$0xff] %v178_v11  ;;  %v212_v28 = vld [vmem:[%s2241_s29 + $0x188] sm:$0xff] }
  0x25   : >> { %v182_v13 = vld [vmem:[%s2241_s29 + $0x1a0] sm:$0xff]  ;;  %181 = vst [vmem:[%s2243_s30 + $0xc0] sm:$0xff] %v180_v12  ;;  %v214_v29 = vld [vmem:[%s2241_s29 + $0x1a8] sm:$0xff] }
  0x26   : >> { %v184_v14 = vld [vmem:[%s2241_s29 + $0x1c0] sm:$0xff]  ;;  %183 = vst [vmem:[%s2243_s30 + $0xd0] sm:$0xff] %v182_v13  ;;  %v216_v30 = vld [vmem:[%s2241_s29 + $0x1c8] sm:$0xff] }
  0x27   : >> { %v186_v15 = vld [vmem:[%s2241_s29 + $0x1e0] sm:$0xff]  ;;  %185 = vst [vmem:[%s2243_s30 + $0xe0] sm:$0xff] %v184_v14  ;;  %v218_v31 = vld [vmem:[%s2241_s29 + $0x1e8] sm:$0xff] }
  0x28   : >> { %187 = vst [vmem:[%s2243_s30 + $0xf0] sm:$0xff] %v186_v15 }
  0x29   : >> { %189 = vst [vmem:[%s2243_s30 + $0x8] sm:$0xff] %v188_v16 }
  0x2a   : >> { %191 = vst [vmem:[%s2243_s30 + $0x18] sm:$0xff] %v190_v17 }
  0x2b   : >> { %193 = vst [vmem:[%s2243_s30 + $0x28] sm:$0xff] %v192_v18 }
  0x2c   : >> { %195 = vst [vmem:[%s2243_s30 + $0x38] sm:$0xff] %v194_v19 }
  0x2d   : >> { %197 = vst [vmem:[%s2243_s30 + $0x48] sm:$0xff] %v196_v20 }
  0x2e   : >> { %199 = vst [vmem:[%s2243_s30 + $0x58] sm:$0xff] %v198_v21 }
  0x2f   : >> { %201 = vst [vmem:[%s2243_s30 + $0x68] sm:$0xff] %v200_v22 }
  0x30   : >> { %203 = vst [vmem:[%s2243_s30 + $0x78] sm:$0xff] %v202_v23 }
  0x31   : >> { %205 = vst [vmem:[%s2243_s30 + $0x88] sm:$0xff] %v204_v24 }
  0x32   : >> { %207 = vst [vmem:[%s2243_s30 + $0x98] sm:$0xff] %v206_v25 }
  0x33   : >> { %209 = vst [vmem:[%s2243_s30 + $0xa8] sm:$0xff] %v208_v26 }
  0x34   : >> { %211 = vst [vmem:[%s2243_s30 + $0xb8] sm:$0xff] %v210_v27  ;;  %152 = sbr.rel (!%p149_p11) target bundleno = 24 (0x18), region = 159 }
  0x35   : >> { %213 = vst [vmem:[%s2243_s30 + $0xc8] sm:$0xff] %v212_v28 }
  0x36   : >> { %215 = vst [vmem:[%s2243_s30 + $0xd8] sm:$0xff] %v214_v29 }
  0x37   : >> { %217 = vst [vmem:[%s2243_s30 + $0xe8] sm:$0xff] %v216_v30 }
  0x38   : >> { %219 = vst [vmem:[%s2243_s30 + $0xf8] sm:$0xff] %v218_v31 }
  0x39 LB: >> { %v243_v32 = vld [vmem:[%s2142_s6] sm:$0xff]  ;;  %v245_v33 = vld [vmem:[%s2142_s6 + $0x8] sm:$0xff]  ;;  %s247_s15 = sadd.s32 1, %s2146_s7  ;;  %s237_s8 = sadd.s32 1, %s2150_s8   ;;  %s2150_s8 = sphi %s2148_s8, %s237_s8   ;;  %s2146_s7 = sphi %s2144_s7, %s2145_s7   ;;  %s2142_s6 = sphi %s2140_s6, %s1788_s6   ;;  %s2138_s5 = sphi %s233_s5, %s1790_s5  }
  0x3a   : >> { %244 = vst [vmem:[%s2138_s5] sm:$0xff] %v243_v32  ;;  %p248_p12 = scmp.ge.s32.totalorder %s247_s15, 6  ;;  %p236_p13 = scmp.ge.s32.totalorder %s237_s8, 6 }
  0x3b   : >> { %246 = vst [vmem:[%s2138_s5 + $0x8] sm:$0xff] %v245_v33 }
  0x3c   : >> { %s4053_s15 = smov (%p248_p12, %s247_s15), 0  ;;  %239 = sbr.rel (!%p236_p13) target bundleno = 57 (0x39), region = 170 }
  0x3d   : >> { %s1785_s16 = sshll.u32 %s4053_s15, 5  ;;  %s1786_s18 = sshll.u32 %s4053_s15, 4 }
  0x3e   : >> { %s1787_s21 = scalar_lea.vmem %s2241_s29, %s1785_s16  ;;  %s1789_s24 = scalar_lea.vmem %s2243_s30, %s1786_s18 [#allocation6] }
  0x3f   : >> { %s1788_s6 = scalar_lea.vmem %s1787_s21, 512   ;;  %s1790_s5 = scalar_lea.vmem %s1789_s24, 256 [#allocation6]  }
  0x40   : >> { %s2145_s7 = smov %s4053_s15  }
  0x41 PF: > { %259 = sbr.rel (!%p2212_p4) target bundleno = 101 (0x65), region = 50  ;;  %s261_s25 = sand.u32 (%p2212_p4), 1, %s2118_s11  }
  0x42   : > { %s1792_s26 = sshll.u32 (%p2212_p4), %s2126_s13, 3  ;;  %s1791_s27 = sshll.u32 (%p2212_p4), %s261_s25, 8 }
  0x43   : > { %s2333_s4 = scalar_lea.vmem (%p2212_p4), %s3979_s1, %s1792_s26  ;;  %s2338_s19 = scalar_lea.vmem (%p2212_p4), [#allocation7], %s1791_s27 }
  0x44   : > { %v359_v34 = vld [vmem:[%s2333_s4] sm:$0xff] (%p2212_p4)  ;;  %v361_v35 = vld [vmem:[%s2333_s4 + $0x10] sm:$0xff] (%p2212_p4) }
  0x45   : > { %v363_v36 = vld [vmem:[%s2333_s4 + $0x20] sm:$0xff] (%p2212_p4)  ;;  %360 = vst [vmem:[%s2338_s19] sm:$0xff] (%p2212_p4), %v359_v34  ;;  %v365_v37 = vld [vmem:[%s2333_s4 + $0x30] sm:$0xff] (%p2212_p4) }
  0x46   : > { %362 = vst [vmem:[%s2338_s19 + $0x8] sm:$0xff] %v361_v35  ;;  %v367_v38 = vld [vmem:[%s2333_s4 + $0x40] sm:$0xff]  ;;  %v369_v39 = vld [vmem:[%s2333_s4 + $0x50] sm:$0xff] }
  0x47   : > { %364 = vst [vmem:[%s2338_s19 + $0x10] sm:$0xff] %v363_v36  ;;  %v371_v40 = vld [vmem:[%s2333_s4 + $0x60] sm:$0xff]  ;;  %v373_v41 = vld [vmem:[%s2333_s4 + $0x70] sm:$0xff] }
  0x48   : > { %366 = vst [vmem:[%s2338_s19 + $0x18] sm:$0xff] %v365_v37  ;;  %v375_v42 = vld [vmem:[%s2333_s4 + $0x80] sm:$0xff]  ;;  %v377_v43 = vld [vmem:[%s2333_s4 + $0x90] sm:$0xff] }
  0x49   : > { %368 = vst [vmem:[%s2338_s19 + $0x20] sm:$0xff] %v367_v38  ;;  %v379_v44 = vld [vmem:[%s2333_s4 + $0xa0] sm:$0xff]  ;;  %v381_v45 = vld [vmem:[%s2333_s4 + $0xb0] sm:$0xff] }
  0x4a   : > { %370 = vst [vmem:[%s2338_s19 + $0x28] sm:$0xff] %v369_v39  ;;  %v383_v46 = vld [vmem:[%s2333_s4 + $0xc0] sm:$0xff]  ;;  %v385_v47 = vld [vmem:[%s2333_s4 + $0xd0] sm:$0xff] }
  0x4b   : > { %372 = vst [vmem:[%s2338_s19 + $0x30] sm:$0xff] %v371_v40  ;;  %v387_v48 = vld [vmem:[%s2333_s4 + $0xe0] sm:$0xff]  ;;  %v389_v49 = vld [vmem:[%s2333_s4 + $0xf0] sm:$0xff] }
  0x4c   : > { %374 = vst [vmem:[%s2338_s19 + $0x38] sm:$0xff] %v373_v41  ;;  %v391_v50 = vld [vmem:[%s2333_s4 + $0x100] sm:$0xff]  ;;  %v393_v51 = vld [vmem:[%s2333_s4 + $0x110] sm:$0xff] }
  0x4d   : > { %376 = vst [vmem:[%s2338_s19 + $0x40] sm:$0xff] %v375_v42  ;;  %v395_v52 = vld [vmem:[%s2333_s4 + $0x120] sm:$0xff]  ;;  %v397_v53 = vld [vmem:[%s2333_s4 + $0x130] sm:$0xff] }
  0x4e   : > { %378 = vst [vmem:[%s2338_s19 + $0x48] sm:$0xff] %v377_v43  ;;  %v399_v54 = vld [vmem:[%s2333_s4 + $0x140] sm:$0xff]  ;;  %v401_v55 = vld [vmem:[%s2333_s4 + $0x150] sm:$0xff] }
  0x4f   : > { %380 = vst [vmem:[%s2338_s19 + $0x50] sm:$0xff] %v379_v44  ;;  %v403_v56 = vld [vmem:[%s2333_s4 + $0x160] sm:$0xff]  ;;  %v405_v57 = vld [vmem:[%s2333_s4 + $0x170] sm:$0xff] }
  0x50   : > { %382 = vst [vmem:[%s2338_s19 + $0x58] sm:$0xff] %v381_v45  ;;  %v407_v58 = vld [vmem:[%s2333_s4 + $0x180] sm:$0xff]  ;;  %v409_v59 = vld [vmem:[%s2333_s4 + $0x190] sm:$0xff] }
  0x51   : > { %384 = vst [vmem:[%s2338_s19 + $0x60] sm:$0xff] %v383_v46  ;;  %v411_v60 = vld [vmem:[%s2333_s4 + $0x1a0] sm:$0xff]  ;;  %v413_v61 = vld [vmem:[%s2333_s4 + $0x1b0] sm:$0xff] }
  0x52   : > { %386 = vst [vmem:[%s2338_s19 + $0x68] sm:$0xff] %v385_v47  ;;  %v415_v62 = vld [vmem:[%s2333_s4 + $0x1c0] sm:$0xff]  ;;  %v417_v63 = vld [vmem:[%s2333_s4 + $0x1d0] sm:$0xff] }
  0x53   : > { %388 = vst [vmem:[%s2338_s19 + $0x70] sm:$0xff] %v387_v48  ;;  %v419_v0 = vld [vmem:[%s2333_s4 + $0x1e0] sm:$0xff]  ;;  %v421_v1 = vld [vmem:[%s2333_s4 + $0x1f0] sm:$0xff] }
  0x54   : > { %390 = vst [vmem:[%s2338_s19 + $0x78] sm:$0xff] %v389_v49 }
  0x55   : > { %392 = vst [vmem:[%s2338_s19 + $0x80] sm:$0xff] %v391_v50 }
  0x56   : > { %394 = vst [vmem:[%s2338_s19 + $0x88] sm:$0xff] %v393_v51 }
  0x57   : > { %396 = vst [vmem:[%s2338_s19 + $0x90] sm:$0xff] %v395_v52 }
  0x58   : > { %398 = vst [vmem:[%s2338_s19 + $0x98] sm:$0xff] %v397_v53 }
  0x59   : > { %400 = vst [vmem:[%s2338_s19 + $0xa0] sm:$0xff] %v399_v54 }
  0x5a   : > { %402 = vst [vmem:[%s2338_s19 + $0xa8] sm:$0xff] %v401_v55 }
  0x5b   : > { %404 = vst [vmem:[%s2338_s19 + $0xb0] sm:$0xff] %v403_v56 }
  0x5c   : > { %406 = vst [vmem:[%s2338_s19 + $0xb8] sm:$0xff] %v405_v57 }
  0x5d   : > { %408 = vst [vmem:[%s2338_s19 + $0xc0] sm:$0xff] %v407_v58 }
  0x5e   : > { %410 = vst [vmem:[%s2338_s19 + $0xc8] sm:$0xff] %v409_v59 }
  0x5f   : > { %412 = vst [vmem:[%s2338_s19 + $0xd0] sm:$0xff] %v411_v60 }
  0x60   : > { %414 = vst [vmem:[%s2338_s19 + $0xd8] sm:$0xff] %v413_v61 }
  0x61   : > { %416 = vst [vmem:[%s2338_s19 + $0xe0] sm:$0xff] %v415_v62 }
  0x62   : > { %418 = vst [vmem:[%s2338_s19 + $0xe8] sm:$0xff] %v417_v63 }
  0x63   : > { %420 = vst [vmem:[%s2338_s19 + $0xf0] sm:$0xff] %v419_v0 }
  0x64   : > { %422 = vst [vmem:[%s2338_s19 + $0xf8] sm:$0xff] %v421_v1 }
  0x65 PF: > { %p1793_p0 = scmp.ge.s32.totalorder %s2130_s14, 1  ;;  %p427_p1 = scmp.lt.s32.totalorder %s2130_s14, 3 }
  0x67   : > { %p428_p2 = pnand %p1793_p0, %p427_p1 }
  0x69   : > { %431 = sbr.rel (%p428_p2) target bundleno = 422 (0x1a6), region = 88 }
  0x6e   : > { %s2404_s29 = sand.u32 1, %s2114_s10   ;;  %vm480_vm0 = vcmask 7168   ;;  %v3981_v2 = vmov 0   ;;  %v2153_v3 = vmov 0.0   ;;  %s1889_s16 = sshll.u32 %s2122_s12, 4 }
  0x6f   : > { %2017 = vset.pattern.permute.xlu2 %v3981_v2  ;;  %2016 = vset.pattern.permute.xlu1 %v3981_v2  ;;  %s1795_s30 = sshll.u32 %s2404_s29, 8  ;;  %481 = vst.msk [vmem:[#allocation4] sm:$0xff] %vm480_vm0, %v2153_v3  ;;  %s1794_s6 = sshll.u32 %s2404_s29, 9 }
  0x70   : > { %2015 = vset.pattern.permute.xlu0 %v3981_v2  ;;  %s2412_s5 = scalar_lea.vmem [#allocation7], %s1795_s30  ;;  %s1796_s7 = sshll.u32 %s2404_s29, 6 }
  0x71   : > { %v2415_v4 = vld [vmem:[%s2412_s5 + $0x18] sm:$0xff]  ;;  %v2418_v5 = vld [vmem:[%s2412_s5 + $0x8] sm:$0xff]  ;;  %v2421_v6 = vld [vmem:[%s2412_s5] sm:$0xff]  ;;  %s2779_s8 = scalar_lea.vmem [#allocation6], %s1794_s6  ;;  %s2831_s15 = scalar_lea.vmem [#allocation8], %s1796_s7 }
  0x72   : > { %vm548_vm1 = vcmp.ne.s32.totalorder %v2415_v4, 0  ;;  %vm546_vm2 = vcmp.ne.s32.totalorder %v2418_v5, 0  ;;  %vm487_vm3 = vcmp.eq.s32.totalorder %v2421_v6, 0  ;;  %v2427_v7 = vld [vmem:[%s2412_s5 + $0x10] sm:$0xff]  ;;  %v2433_v11 = vld [vmem:[%s2412_s5 + $0x20] sm:$0xff]  ;;  %vm545_vm5 = vcmp.ne.s32.totalorder %v2421_v6, 0  ;;  %s1637_s24 = scalar_lea.hbm %s3980_s2, %s1889_s16 }
  0x73   : > { %v582_v8 = vsel %vm548_vm1, 1, %v3981_v2  ;;  %v580_v9 = vsel %vm546_vm2, 1, %v3981_v2  ;;  %v1798_v10 = vsel %vm546_vm2, 1.0, %v2153_v3  ;;  %v488_v12 = vsel %vm487_vm3, 1, %v3981_v2  ;;  %v2444_v17 = vld [vmem:[%s2412_s5 + $0x28] sm:$0xff]  ;;  %v2450_v22 = vld [vmem:[%s2412_s5 + $0x30] sm:$0xff] }
  0x74   : > { %605 = vperm.xlu2 %2017, %v582_v8   ;;  %599 = vperm.xlu1 %2016, %v580_v9   ;;  %v925_v13 = vsel %vm480_vm0, %v1798_v10, 0.0  ;;  %vm547_vm4 = vcmp.ne.s32.totalorder %v2427_v7, 0  ;;  %v1800_v14 = vsel %vm548_vm1, 1.0, %v2153_v3  ;;  %vm549_vm6 = vcmp.ne.s32.totalorder %v2433_v11, 0  ;;  %v2458_v28 = vld [vmem:[%s2412_s5 + $0x38] sm:$0xff]  ;;  %v2469_v33 = vld [vmem:[%s2412_s5 + $0x40] sm:$0xff] }
  0x75   : > { %490 = vperm.xlu0 %2015, %v488_v12   ;;  %v1799_v15 = vsel %vm547_vm4, 1.0, %v2153_v3  ;;  %v1797_v16 = vsel %vm545_vm5, 1.0, %v2153_v3  ;;  %v1801_v20 = vsel %vm549_vm6, 1.0, %v2153_v3  ;;  %v929_v23 = vsel %vm480_vm0, %v1800_v14, 0.0  ;;  %v2475_v37 = vld [vmem:[%s2412_s5 + $0x48] sm:$0xff]  ;;  %v2480_v40 = vld [vmem:[%s2412_s5 + $0x50] sm:$0xff] }
  0x76   : > { %v927_v18 = vsel %vm480_vm0, %v1799_v15, 0.0  ;;  %v924_v19 = vsel %vm480_vm0, %v1797_v16, 0.0  ;;  %v583_v24 = vsel %vm549_vm6, 1, %v3981_v2  ;;  %v581_v25 = vsel %vm547_vm4, 1, %v3981_v2  ;;  %v2498_v48 = vld [vmem:[%s2412_s5 + $0x58] sm:$0xff]  ;;  %v2506_v52 = vld [vmem:[%s2412_s5 + $0x60] sm:$0xff] }
  0x77   : > { %v926_v21 = vadd.f32 %v925_v13, %v924_v19  ;;  %vm550_vm7 = vcmp.ne.s32.totalorder %v2444_v17, 0  ;;  %v579_v26 = vsel %vm545_vm5, 1, %v3981_v2  ;;  %v931_v30 = vsel %vm480_vm0, %v1801_v20, 0.0  ;;  %v2511_v55 = vld [vmem:[%s2412_s5 + $0x68] sm:$0xff]  ;;  %v2522_v60 = vld [vmem:[%s2412_s5 + $0x70] sm:$0xff]  ;;  %v2539_v9 = vld [vmem:[%s2412_s5 + $0x78] sm:$0xff] }
  0x78   : > { %v1802_v29 = vsel %vm550_vm7, 1.0, %v2153_v3  ;;  %vm551_vm8 = vcmp.ne.s32.totalorder %v2450_v22, 0  ;;  %vm552_vm9 = vcmp.ne.s32.totalorder %v2458_v28, 0  ;;  %vm553_vm10 = vcmp.ne.s32.totalorder %v2469_v33, 0  ;;  %s1638_s25 = sshll.u32 %s2831_s15, 4  ;;  %s1640_s26 = sshll.u32 %s1637_s24, 4  ;;  %s1639_s25 = int_to_ptr.vmem [resolvable:$true] %s1638_s25  ;;  %s1641_s26 = int_to_ptr.hbm [resolvable:$true] %s1640_s26 }
  0x79   : > { %v928_v27 = vadd.f32 %v927_v18, %v926_v21  ;;  %v1803_v32 = vsel %vm551_vm8, 1.0, %v2153_v3  ;;  %v933_v34 = vsel %vm480_vm0, %v1802_v29, 0.0  ;;  %v1804_v35 = vsel %vm552_vm9, 1.0, %v2153_v3  ;;  %s1626_s27 = scalar_lea.sflag [#allocation9], %s2404_s29  ;;  %s2034_s28 = sshra.s32 %s1641_s26, 4  ;;  %s2035_s28 = int_to_ptr.hbm [resolvable:$true] %s2034_s28 }
  0x7a   : > { %v935_v38 = vsel %vm480_vm0, %v1803_v32, 0.0  ;;  %v1805_v41 = vsel %vm553_vm10, 1.0, %v2153_v3  ;;  %v586_v42 = vsel %vm552_vm9, 1, %v3981_v2  ;;  %v937_v43 = vsel %vm480_vm0, %v1804_v35, 0.0  ;;  %s2036_s12 = scalar_lea.hbm %s2035_s28, 64  ;;  %s2040_s19 = scalar_lea.hbm %s3980_s2, 128 }
  0x7b   : > { %v930_v31 = vadd.f32 %v929_v23, %v928_v27  ;;  %v585_v44 = vsel %vm551_vm8, 1, %v3981_v2  ;;  %vm554_vm11 = vcmp.ne.s32.totalorder %v2475_v37, 0  ;;  %v584_v45 = vsel %vm550_vm7, 1, %v3981_v2  ;;  %p2037_p3 = scmp.ne.s32.totalorder %s2035_s28, %s2036_s12  ;;  %p2041_p7 = scmp.lt.s32.totalorder %s2035_s28, %s3980_s2 }
  0x7c   : > { %608 = vperm.xlu2 %2017, %v583_v24   ;;  %602 = vperm.xlu1 %2016, %v581_v25   ;;  %v1806_v47 = vsel %vm554_vm11, 1.0, %v2153_v3  ;;  %vm555_vm12 = vcmp.ne.s32.totalorder %v2480_v40, 0  ;;  %v939_v49 = vsel %vm480_vm0, %v1805_v41, 0.0  ;;  %vm556_vm13 = vcmp.ne.s32.totalorder %v2498_v48, 0  ;;  %p2042_p8 = scmp.lt.s32.totalorder %s2040_s19, %s2036_s12 }
  0x7d   : > { %596 = vperm.xlu0 %2015, %v579_v26   ;;  %v932_v36 = vadd.f32 %v931_v30, %v930_v31  ;;  %v1807_v50 = vsel %vm555_vm12, 1.0, %v2153_v3  ;;  %v941_v53 = vsel %vm480_vm0, %v1806_v47, 0.0  ;;  %v1808_v56 = vsel %vm556_vm13, 1.0, %v2153_v3  ;;  %v906_v26 = vld [vmem:[#allocation4] sm:$0xff]  ;;  %v2618_v47 = vld [vmem:[%s2412_s5 + $0x98] sm:$0xff]  ;;  %p2038_p4 = pnand %p2037_p3, %p2216_p5 }
  0x7e   : > { %v943_v57 = vsel %vm480_vm0, %v1807_v50, 0.0  ;;  %vm557_vm14 = vcmp.ne.s32.totalorder %v2506_v52, 0  ;;  %v589_v61 = vsel %vm555_vm12, 1, %v3981_v2  ;;  %v588_v62 = vsel %vm554_vm11, 1, %v3981_v2  ;;  %p2043_p11 = por %p2042_p8, %p2041_p7 }
  0x7f   : > { %v934_v39 = vadd.f32 %v933_v34, %v932_v36  ;;  %v1809_v59 = vsel %vm557_vm14, 1.0, %v2153_v3  ;;  %vm558_vm15 = vcmp.ne.s32.totalorder %v2511_v55, 0  ;;  %v945_v63 = vsel %vm480_vm0, %v1808_v56, 0.0  ;;  %p2039_p6 = pneg %p2038_p4 }
  0x80   : > { %v587_v0 = vsel %vm553_vm10, 1, %v3981_v2  ;;  %v1810_v1 = vsel %vm558_vm15, 1.0, %v2153_v3  ;;  %v947_v10 = vsel %vm480_vm0, %v1809_v59, 0.0  ;;  %vm559_vm1 = vcmp.ne.s32.totalorder %v2522_v60, 0 }
  0x81   : > { %v936_v46 = vadd.f32 %v935_v38, %v934_v39  ;;  %v1811_v13 = vsel %vm559_vm1, 1.0, %v2153_v3  ;;  %v949_v14 = vsel %vm480_vm0, %v1810_v1, 0.0  ;;  %vm560_vm2 = vcmp.ne.s32.totalorder %v2539_v9, 0  ;;  %v2588_v38 = vld [vmem:[%s2412_s5 + $0x80] sm:$0xff]  ;;  %p2044_p12 = pnand %p2043_p11, %p2039_p6 }
  0x82   : > { %v1812_v16 = vsel %vm560_vm2, 1.0, %v2153_v3  ;;  %v951_v18 = vsel %vm480_vm0, %v1811_v13, 0.0  ;;  %v592_v20 = vsel %vm558_vm15, 1, %v3981_v2  ;;  %v591_v21 = vsel %vm557_vm14, 1, %v3981_v2 }
  0x83   : > { %v938_v51 = vadd.f32 %v937_v43, %v936_v46  ;;  %v953_v23 = vsel %vm480_vm0, %v1812_v16, 0.0  ;;  %v590_v24 = vsel %vm556_vm13, 1, %v3981_v2  ;;  %vm561_vm3 = vcmp.eq.s32.totalorder %v2421_v6, 2  ;;  %v2610_v43 = vld [vmem:[%s2412_s5 + $0xa0] sm:$0xff] }
  0x84   : > { %617 = vperm.xlu2 %2017, %v586_v42   ;;  %614 = vperm.xlu1 %2016, %v585_v44   ;;  %v594_v30 = vsel %vm560_vm2, 1, %v3981_v2  ;;  %v744_v31 = vsel %vm561_vm3, 1, %v3981_v2  ;;  %v593_v32 = vsel %vm559_vm1, 1, %v3981_v2  ;;  %vm563_vm4 = vcmp.eq.s32.totalorder %v2427_v7, 2 }
  0x85   : > { %611 = vperm.xlu0 %2015, %v584_v45   ;;  %v940_v54 = vadd.f32 %v939_v49, %v938_v51  ;;  %vm564_vm5 = vcmp.eq.s32.totalorder %v2415_v4, 2  ;;  %vm562_vm6 = vcmp.eq.s32.totalorder %v2418_v5, 2  ;;  %v746_v6 = vsel %vm563_vm4, 1, %v3981_v2  ;;  %v2581_v4 = vld [vmem:[%s2412_s5 + $0x88] sm:$0xff] }
  0x86   : > { %v747_v34 = vsel %vm564_vm5, 1, %v3981_v2  ;;  %v745_v35 = vsel %vm562_vm6, 1, %v3981_v2  ;;  %vm566_vm7 = vcmp.eq.s32.totalorder %v2444_v17, 2  ;;  %vm567_vm8 = vcmp.eq.s32.totalorder %v2450_v22, 2  ;;  %v2594_v22 = vld [vmem:[%s2412_s5 + $0x90] sm:$0xff]  ;;  %v2624_v49 = vld [vmem:[%s2412_s5 + $0xa8] sm:$0xff] }
  0x87   : > { %v942_v58 = vadd.f32 %v941_v53, %v940_v54  ;;  %vm565_vm9 = vcmp.eq.s32.totalorder %v2433_v11, 2  ;;  %v749_v5 = vsel %vm566_vm7, 1, %v3981_v2  ;;  %v750_v7 = vsel %vm567_vm8, 1, %v3981_v2 }
  0x88   : > { %v748_v36 = vsel %vm565_vm9, 1, %v3981_v2  ;;  %vm1092_vm10 = vcmp.ne.s32.totalorder %v2581_v4, 0  ;;  %vm1091_vm11 = vcmp.ne.s32.totalorder %v2588_v38, 0  ;;  %vm569_vm12 = vcmp.eq.s32.totalorder %v2469_v33, 2 }
  0x89   : > { %v944_v8 = vadd.f32 %v943_v57, %v942_v58  ;;  %v1862_v17 = vsel %vm1092_vm10, 1.0, %v2153_v3  ;;  %v1861_v11 = vsel %vm1091_vm11, 1.0, %v2153_v3  ;;  %vm570_vm13 = vcmp.eq.s32.totalorder %v2475_v37, 2  ;;  %v2640_v58 = vld [vmem:[%s2412_s5 + $0xb8] sm:$0xff] }
  0x8a   : > { %v1469_v39 = vsel %vm480_vm0, %v1862_v17, 0.0  ;;  %vm1093_vm14 = vcmp.ne.s32.totalorder %v2594_v22, 0  ;;  %v1468_v41 = vsel %vm480_vm0, %v1861_v11, 0.0  ;;  %vm568_vm15 = vcmp.eq.s32.totalorder %v2458_v28, 2 }
  0x8b   : > { %v946_v12 = vadd.f32 %v945_v63, %v944_v8  ;;  %v1863_v42 = vsel %vm1093_vm14, 1.0, %v2153_v3  ;;  %v752_v44 = vsel %vm569_vm12, 1, %v3981_v2  ;;  %v753_v33 = vsel %vm570_vm13, 1, %v3981_v2  ;;  %v2648_v63 = vld [vmem:[%s2412_s5 + $0xb0] sm:$0xff] }
  0x8c   : > { %626 = vperm.xlu2 %2017, %v589_v61   ;;  %623 = vperm.xlu1 %2016, %v588_v62   ;;  %v1470_v45 = vadd.f32 %v1469_v39, %v1468_v41  ;;  %v751_v37 = vsel %vm568_vm15, 1, %v3981_v2  ;;  %v1471_v46 = vsel %vm480_vm0, %v1863_v42, 0.0  ;;  %vm1095_vm1 = vcmp.ne.s32.totalorder %v2610_v43, 0 }
  0x8d   : > { %620 = vperm.xlu0 %2015, %v587_v0   ;;  %v948_v15 = vadd.f32 %v947_v10, %v946_v12  ;;  %v1865_v28 = vsel %vm1095_vm1, 1.0, %v2153_v3  ;;  %vm1094_vm2 = vcmp.ne.s32.totalorder %v2618_v47, 0  ;;  %vm572_vm3 = vcmp.eq.s32.totalorder %v2498_v48, 2  ;;  %v2654_v0 = vld [vmem:[%s2412_s5 + $0xc0] sm:$0xff] }
  0x8e   : > { %v1864_v50 = vsel %vm1094_vm2, 1.0, %v2153_v3  ;;  %v1472_v51 = vadd.f32 %v1471_v46, %v1470_v45  ;;  %vm573_vm4 = vcmp.eq.s32.totalorder %v2506_v52, 2  ;;  %v1475_v54 = vsel %vm480_vm0, %v1865_v28, 0.0 }
  0x8f   : > { %v950_v19 = vadd.f32 %v949_v14, %v948_v15  ;;  %v1473_v53 = vsel %vm480_vm0, %v1864_v50, 0.0  ;;  %vm1096_vm5 = vcmp.ne.s32.totalorder %v2624_v49, 0  ;;  %vm571_vm6 = vcmp.eq.s32.totalorder %v2480_v40, 2  ;;  %v2670_v15 = vld [vmem:[%s2412_s5 + $0xd0] sm:$0xff] }
  0x90   : > { %v1866_v56 = vsel %vm1096_vm5, 1.0, %v2153_v3  ;;  %v1474_v57 = vadd.f32 %v1473_v53, %v1472_v51  ;;  %v755_v59 = vsel %vm572_vm3, 1, %v3981_v2  ;;  %v756_v48 = vsel %vm573_vm4, 1, %v3981_v2  ;;  %v2746_v51 = vld [vmem:[%s2412_s5 + $0xf8] sm:$0xff] }
  0x91   : > { %v952_v25 = vadd.f32 %v951_v18, %v950_v19  ;;  %v754_v52 = vsel %vm571_vm6, 1, %v3981_v2  ;;  %v1477_v62 = vsel %vm480_vm0, %v1866_v56, 0.0  ;;  %vm1098_vm7 = vcmp.ne.s32.totalorder %v2640_v58, 0 }
  0x92   : > { %v1476_v61 = vadd.f32 %v1475_v54, %v1474_v57  ;;  %v1868_v40 = vsel %vm1098_vm7, 1.0, %v2153_v3  ;;  %vm1097_vm8 = vcmp.ne.s32.totalorder %v2648_v63, 0  ;;  %vm575_vm9 = vcmp.eq.s32.totalorder %v2522_v60, 2 }
  0x93   : > { %v954_v27 = vadd.f32 %v953_v23, %v952_v25  ;;  %v1867_v1 = vsel %vm1097_vm8, 1.0, %v2153_v3  ;;  %vm576_vm12 = vcmp.eq.s32.totalorder %v2539_v9, 2  ;;  %v1481_v12 = vsel %vm480_vm0, %v1868_v40, 0.0 }
  0x94   : > { %635 = vperm.xlu2 %2017, %v592_v20   ;;  %632 = vperm.xlu1 %2016, %v591_v21   ;;  %v1478_v8 = vadd.f32 %v1477_v62, %v1476_v61  ;;  %v1479_v10 = vsel %vm480_vm0, %v1867_v1, 0.0  ;;  %vm1099_vm13 = vcmp.ne.s32.totalorder %v2654_v0, 0  ;;  %vm574_vm15 = vcmp.eq.s32.totalorder %v2511_v55, 2  ;;  %v2678_v20 = vld [vmem:[%s2412_s5 + $0xd8] sm:$0xff]  ;;  %v2681_v55 = vld [vmem:[%s2412_s5 + $0xc8] sm:$0xff] }
  0x95   : > { %629 = vperm.xlu0 %2015, %v590_v24   ;;  %v955_v29 = vadd.f32 %v954_v27, %v906_v26  ;;  %v1869_v13 = vsel %vm1099_vm13, 1.0, %v2153_v3  ;;  %v758_v16 = vsel %vm575_vm9, 1, %v3981_v2  ;;  %v759_v18 = vsel %vm576_vm12, 1, %v3981_v2 }
  0x96   : > { %v1480_v14 = vadd.f32 %v1479_v10, %v1478_v8  ;;  %v757_v9 = vsel %vm574_vm15, 1, %v3981_v2  ;;  %v1483_v19 = vsel %vm480_vm0, %v1869_v13, 0.0  ;;  %vm1101_vm3 = vcmp.ne.s32.totalorder %v2670_v15, 0  ;;  %v2785_v13 = vld [vmem:[%s2779_s8 + $0x38] sm:$0xff] }
  0x97   : > { %956 = vst.msk [vmem:[#allocation4] sm:$0xff] %vm480_vm0, %v955_v29  ;;  %v1871_v21 = vsel %vm1101_vm3, 1.0, %v2153_v3  ;;  %vm1100_vm4 = vcmp.ne.s32.totalorder %v2681_v55, 0  ;;  %vm1102_vm6 = vcmp.ne.s32.totalorder %v2678_v20, 0  ;;  %vm476_vm9 = vcmask 261120  }
  0x98   : > { %v1482_v60 = vadd.f32 %v1481_v12, %v1480_v14  ;;  %v1870_v23 = vsel %vm1100_vm4, 1.0, %v2153_v3  ;;  %v1487_v26 = vsel %vm480_vm0, %v1871_v21, 0.0  ;;  %v1872_v27 = vsel %vm1102_vm6, 1.0, %v2153_v3  ;;  %477 = vst.msk [vmem:[#allocation2 + $0x8] sm:$0xff] %vm476_vm9, %v2153_v3  ;;  %v2782_v12 = vld [vmem:[%s2779_s8 + $0x30] sm:$0xff] }
  0x99   : > { %v1485_v25 = vsel %vm480_vm0, %v1870_v23, 0.0  ;;  %479 = vst.msk [vmem:[#allocation3 + $0x8] sm:$0xff] %vm476_vm9, %v2153_v3  ;;  %v1129_v45 = vsel %vm1095_vm1, 1, %v3981_v2  ;;  %v1128_v28 = vsel %vm1094_vm2, 1, %v3981_v2  ;;  %vm1106_vm12 = vcmp.ne.s32.totalorder %v2746_v51, 0 }
  0x9a   : > { %v1484_v24 = vadd.f32 %v1483_v19, %v1482_v60  ;;  %v1876_v54 = vsel %vm1106_vm12, 1.0, %v2153_v3  ;;  %v1132_v61 = vsel %vm1098_vm7, 1, %v3981_v2  ;;  %v1135_v1 = vsel %vm1101_vm3, 1, %v3981_v2  ;;  %v2795_v60 = vld [vmem:[%s2779_s8 + $0x8] sm:$0xff] }
  0x9b   : > { %v1136_v8 = vsel %vm1102_vm6, 1, %v3981_v2  ;;  %v1134_v10 = vsel %vm1100_vm4, 1, %v3981_v2  ;;  %vm1107_vm1 = vcmp.eq.s32.totalorder %v2588_v38, 2  ;;  %vm1108_vm7 = vcmp.eq.s32.totalorder %v2581_v4, 2 }
  0x9c   : > { %641 = vperm.xlu1 %2016, %v594_v30   ;;  %761 = vperm.xlu2 %2017, %v744_v31   ;;  %v1486_v29 = vadd.f32 %v1485_v25, %v1484_v24  ;;  %v1126_v30 = vsel %vm1092_vm10, 1, %v3981_v2  ;;  %v1127_v31 = vsel %vm1093_vm14, 1, %v3981_v2  ;;  %vm1111_vm15 = vcmp.eq.s32.totalorder %v2610_v43, 2 }
  0x9d   : > { %638 = vperm.xlu0 %2015, %v593_v32   ;;  %v1489_v32 = vsel %vm480_vm0, %v1872_v27, 0.0  ;;  %vm1109_vm3 = vcmp.eq.s32.totalorder %v2594_v22, 2  ;;  %vm1113_vm6 = vcmp.eq.s32.totalorder %v2648_v63, 2  ;;  %v2919_v63 = vld [vmem:[%s2779_s8 + $0x10] sm:$0xff] }
  0x9e   : > { %v1451_v57 = vld [vmem:[#allocation4] sm:$0xff]  ;;  %v2903_v43 = vsel %vm1109_vm3, 1, %v3981_v2 }
  0xa4   : > { %767 = vperm.xlu1 %2016, %v746_v6   ;;  %770 = vperm.xlu2 %2017, %v747_v34   ;;  %v1488_v6 = vadd.f32 %v1487_v26, %v1486_v29  ;;  %v1125_v34 = vsel %vm1091_vm11, 1, %v3981_v2  ;;  %v2821_v26 = vld [vmem:[%s2779_s8 + $0x48] sm:$0xff] }
  0xa5   : > { %764 = vperm.xlu0 %2015, %v745_v35   ;;  %v2711_v35 = vld [vmem:[%s2412_s5 + $0xe8] sm:$0xff]  ;;  %4004 = vst [vmem:[#allocation13_spill] sm:$0xff] %v2821_v26 }
  0xa6   : > { %vm1104_vm10 = vcmp.ne.s32.totalorder %v2711_v35, 0  ;;  %vm1120_vm3 = vcmp.eq.s32.totalorder %v2711_v35, 2 }
  0xa7   : > { %v1874_v17 = vsel %vm1104_vm10, 1.0, %v2153_v3 }
  0xa8   : > { %v1493_v42 = vsel %vm480_vm0, %v1874_v17, 0.0 }
  0xac   : > { %776 = vperm.xlu1 %2016, %v749_v5   ;;  %779 = vperm.xlu2 %2017, %v750_v7   ;;  %v2714_v5 = vld [vmem:[%s2412_s5 + $0xf0] sm:$0xff]  ;;  %v2717_v7 = vld [vmem:[%s2412_s5 + $0xe0] sm:$0xff] }
  0xad   : > { %773 = vperm.xlu0 %2015, %v748_v36   ;;  %v1490_v36 = vadd.f32 %v1489_v32, %v1488_v6  ;;  %vm1105_vm14 = vcmp.ne.s32.totalorder %v2714_v5, 0  ;;  %vm1103_vm11 = vcmp.ne.s32.totalorder %v2717_v7, 0 }
  0xae   : > { %v1875_v39 = vsel %vm1105_vm14, 1.0, %v2153_v3  ;;  %v1873_v41 = vsel %vm1103_vm11, 1.0, %v2153_v3  ;;  %v1131_v3 = vsel %vm1097_vm8, 1, %v3981_v2  ;;  %v1139_v21 = vsel %vm1105_vm14, 1, %v3981_v2 }
  0xaf   : > { %v1495_v46 = vsel %vm480_vm0, %v1875_v39, 0.0  ;;  %v1137_v23 = vsel %vm1103_vm11, 1, %v3981_v2  ;;  %vm1110_vm8 = vcmp.eq.s32.totalorder %v2618_v47, 2  ;;  %v1140_v39 = vsel %vm1106_vm12, 1, %v3981_v2 }
  0xb0   : > { %v2864_v4 = vsel %vm1110_vm8, 1, %v3981_v2  ;;  %v2881_v47 = vsel %vm1111_vm15, 1, %v3981_v2  ;;  %vm1112_vm14 = vcmp.eq.s32.totalorder %v2624_v49, 2  ;;  %vm1119_vm8 = vcmp.eq.s32.totalorder %v2717_v7, 2 }
  0xb4   : > { %785 = vperm.xlu1 %2016, %v752_v44   ;;  %788 = vperm.xlu2 %2017, %v753_v33   ;;  %v1491_v44 = vsel %vm480_vm0, %v1873_v41, 0.0  ;;  %v2867_v41 = vld [vmem:[%s2779_s8 + $0x18] sm:$0xff] }
  0xb5   : > { %782 = vperm.xlu0 %2015, %v751_v37   ;;  %v1492_v33 = vadd.f32 %v1491_v44, %v1490_v36  ;;  %v1130_v37 = vsel %vm1096_vm5, 1, %v3981_v2  ;;  %v1290_v36 = vsel %vm1108_vm7, 1, %v3981_v2 }
  0xb7   : > { %v1494_v50 = vadd.f32 %v1493_v42, %v1492_v33 }
  0xb9   : > { %v1496_v53 = vadd.f32 %v1495_v46, %v1494_v50 }
  0xbc   : > { %794 = vperm.xlu1 %2016, %v755_v59   ;;  %797 = vperm.xlu2 %2017, %v756_v48   ;;  %v1497_v59 = vsel %vm480_vm0, %v1876_v54, 0.0 }
  0xbd   : > { %791 = vperm.xlu0 %2015, %v754_v52   ;;  %v1498_v48 = vadd.f32 %v1497_v59, %v1496_v53  ;;  %v1133_v52 = vsel %vm1099_vm13, 1, %v3981_v2 }
  0xbf   : > { %v1499_v62 = vadd.f32 %v1498_v48, %v1451_v57  ;;  %v2936_v48 = vsel %vm1113_vm6, 1, %v3981_v2  ;;  %vm1118_vm6 = vcmp.eq.s32.totalorder %v2678_v20, 2 }
  0xc1   : > { %1500 = vst.msk [vmem:[#allocation4] sm:$0xff] %vm480_vm0, %v1499_v62 }
  0xc4   : > { %803 = vperm.xlu1 %2016, %v758_v16   ;;  %806 = vperm.xlu2 %2017, %v759_v18   ;;  %v2792_v18 = vld [vmem:[%s2779_s8] sm:$0xff] }
  0xc5   : > { %800 = vperm.xlu0 %2015, %v757_v9   ;;  %v1138_v9 = vsel %vm1104_vm10, 1, %v3981_v2  ;;  %vm1114_vm10 = vcmp.eq.s32.totalorder %v2640_v58, 2 }
  0xc6   : > { %v2946_v62 = vsel %vm1114_vm10, 1, %v3981_v2 }
  0xc8   : > { %v2883_v33 = vld [vmem:[#allocation4] sm:$0xff] }
  0xc9   : > { %2018 = vrcp.f32 %v2883_v33 }
  0xcc   : > { %1145 = vperm.xlu1 %2016, %v1126_v30   ;;  %1148 = vperm.xlu2 %2017, %v1127_v31   ;;  %v1289_v30 = vsel %vm1107_vm1, 1, %v3981_v2  ;;  %v2828_v31 = vld [vmem:[%s2779_s8 + $0x40] sm:$0xff]  ;;  %vm1116_vm1 = vcmp.eq.s32.totalorder %v2681_v55, 2 }
  0xcd   : > { %1142 = vperm.xlu0 %2015, %v1125_v34   ;;  %4005 = vst [vmem:[#allocation14_spill] sm:$0xff] %v2828_v31  ;;  %v2844_v34 = vld [vmem:[%s2779_s8 + $0x78] sm:$0xff] }
  0xce   : > { %v2725_v11 = vpop.permute.xlu2 %605  ;;  %4006 = vst [vmem:[#allocation15_spill] sm:$0xff] %v2844_v34 }
  0xcf   : > { %vm646_vm0 = vcmp.eq.s32.totalorder %v2725_v11, 1 }
  0xd0   : > { %v2810_v24 = vsel %vm646_vm0, %v2782_v12, 0.0  ;;  %v666_v25 = vsel %vm646_vm0, %v2785_v13, 0.0  ;;  %v966_v38 = vsel %vm646_vm0, %v2785_v13, -inf  ;;  %v2841_v6 = vsel %vm646_vm0, %v2782_v12, -inf }
  0xd1   : > { %v2836_v32 = vsel %vm476_vm9, %v666_v25, 0.0  ;;  %v2853_v17 = vsel %vm476_vm9, %v966_v38, -inf }
  0xd4   : > { %1154 = vperm.xlu1 %2016, %v1129_v45   ;;  %1157 = vperm.xlu2 %2017, %v1130_v37   ;;  %v2891_v37 = vld [vmem:[%s2779_s8 + $0x70] sm:$0xff] }
  0xd5   : > { %1151 = vperm.xlu0 %2015, %v1128_v28   ;;  %4008 = vst [vmem:[#allocation17_spill] sm:$0xff] %v2891_v37 }
  0xd6   : > { %v2752_v56 = vpop.permute.xlu2 %608 }
  0xd7   : > { %vm647_vm2 = vcmp.eq.s32.totalorder %v2752_v56, 1 }
  0xd8   : > { %v668_v11 = vsel %vm647_vm2, %v2821_v26, 0.0  ;;  %v2872_v42 = vsel %vm647_vm2, %v2828_v31, 0.0  ;;  %v968_v44 = vsel %vm647_vm2, %v2821_v26, -inf  ;;  %v2888_v45 = vsel %vm647_vm2, %v2828_v31, -inf  ;;  %v3131_v31 = vld [vmem:[%s2779_s8 + $0x50] sm:$0xff] }
  0xd9   : > { %4007 = vst [vmem:[#allocation16_spill] sm:$0xff] %v2888_v45  ;;  %v2907_v53 = vsel %vm476_vm9, %v668_v11, 0.0  ;;  %v2916_v22 = vsel %vm476_vm9, %v968_v44, -inf  ;;  %vm1117_vm2 = vcmp.eq.s32.totalorder %v2670_v15, 2  ;;  %v3036_v15 = vld [vmem:[%s2779_s8 + $0x68] sm:$0xff] }
  0xdc   : > { %1163 = vperm.xlu1 %2016, %v1132_v61   ;;  %1166 = vperm.xlu2 %2017, %v1133_v52   ;;  %v2942_v52 = vld [vmem:[%s2779_s8 + $0xa8] sm:$0xff] }
  0xdd   : > { %1160 = vperm.xlu0 %2015, %v1131_v3   ;;  %4009 = vst [vmem:[#allocation18_spill] sm:$0xff] %v2942_v52  ;;  %v2949_v3 = vsel %vm1112_vm14, 1, %v3981_v2 }
  0xde   : > { %v2765_v40 = vpop.permute.xlu2 %617 }
  0xdf   : > { %4002 = vst [vmem:[#allocation11_spill] sm:$0xff] %v2765_v40  ;;  %vm650_vm13 = vcmp.eq.s32.totalorder %v2765_v40, 1  ;;  %v3055_v40 = vld [vmem:[%s2779_s8 + $0xd8] sm:$0xff] }
  0xe0   : > { %v674_v46 = vsel %vm650_vm13, %v2844_v34, 0.0  ;;  %v974_v54 = vsel %vm650_vm13, %v2844_v34, -inf  ;;  %v2927_v58 = vsel %vm650_vm13, %v2891_v37, 0.0 }
  0xe1   : > { %v2930_v49 = vsel %vm476_vm9, %v674_v46, 0.0  ;;  %v2939_v61 = vsel %vm476_vm9, %v974_v54, -inf }
  0xe4   : > { %1172 = vperm.xlu1 %2016, %v1135_v1   ;;  %1175 = vperm.xlu2 %2017, %v1136_v8   ;;  %v2953_v1 = vld [vmem:[%s2779_s8 + $0x20] sm:$0xff] }
  0xe5   : > { %1169 = vperm.xlu0 %2015, %v1134_v10   ;;  %v2956_v8 = vld [vmem:[%s2779_s8 + $0xa0] sm:$0xff] }
  0xe6   : > { %v2787_v14 = vpop.permute.xlu2 %626  ;;  %v2789_v16 = vpop.permute.xlu1 %599  ;;  %4010 = vst [vmem:[#allocation19_spill] sm:$0xff] %v2956_v8 }
  0xe7   : > { %4003 = vst [vmem:[#allocation12_spill] sm:$0xff] %v2787_v14  ;;  %v491_v19 = vpop.permute.xlu0 %490  ;;  %vm644_vm4 = vcmp.eq.s32.totalorder %v2789_v16, 1  ;;  %vm653_vm12 = vcmp.eq.s32.totalorder %v2787_v14, 1  ;;  %v2981_v16 = vsel %vm1116_vm1, 1, %v3981_v2 }
  0xe8   : > { %vm492_vm5 = vcmp.eq.s32.totalorder %v491_v19, 1  ;;  %v662_v57 = vsel %vm644_vm4, %v2867_v41, 0.0  ;;  %v661_v10 = vsel %vm644_vm4, %v2919_v63, 0.0  ;;  %v2965_v19 = vsel %vm644_vm4, %v2919_v63, -inf }
  0xe9   : > { %v493_v27 = vsel %vm492_vm5, -inf, %v2792_v18  ;;  %v494_v29 = vsel %vm492_vm5, -inf, %v2795_v60  ;;  %v680_v25 = vsel %vm653_vm12, %v2942_v52, 0.0  ;;  %v980_v38 = vsel %vm653_vm12, %v2942_v52, -inf }
  0xea   : > { %495 = vst [vmem:[%s2831_s15] sm:$0xff] %v493_v27  ;;  %v2978_v27 = vpop.eup %2018  ;;  %vm1115_vm5 = vcmp.eq.s32.totalorder %v2654_v0, 2  ;;  %v3010_v2 = vsel %vm476_vm9, %v980_v38, -inf }
  0xeb   : > { %496 = vst.msk [vmem:[%s2831_s15 + $0x8] sm:$0xff] %vm476_vm9, %v494_v29  ;;  %vm1595_vm1 = vweird.f32 %v2978_v27 }
  0xec   : > { %1181 = vperm.xlu1 %2016, %v1138_v9   ;;  %1184 = vperm.xlu2 %2017, %v1139_v21   ;;  %v708_v9 = vsel %vm476_vm9, %v662_v57, 0.0  ;;  %v962_v21 = vsel %vm644_vm4, %v2867_v41, -inf  ;;  %4011 = vst [vmem:[#allocation20_spill] sm:$0xff] %v3010_v2 }
  0xed   : > { %1178 = vperm.xlu0 %2015, %v1137_v23   ;;  %v3001_v54 = vsel %vm476_vm9, %v962_v21, -inf  ;;  %v4012_v21 = vmov 0  }
  0xee   : > { %v2896_v28 = vpop.permute.xlu2 %635  ;;  %v2898_v50 = vpop.permute.xlu1 %602 }
  0xef   : > { %v597_v56 = vpop.permute.xlu0 %596  ;;  %vm645_vm0 = vcmp.eq.s32.totalorder %v2898_v50, 1  ;;  %vm656_vm4 = vcmp.eq.s32.totalorder %v2896_v28, 1  ;;  %v3551_v28 = vld [vmem:[%s2779_s8 + $0x1b0] sm:$0xff] }
  0xf0   : > { %vm643_vm11 = vcmp.eq.s32.totalorder %v597_v56, 1  ;;  %v663_v29 = vsel %vm645_vm0, %v2953_v1, 0.0  ;;  %v3049_v14 = vsel %vm645_vm0, %v2953_v1, -inf }
  0xf1   : > { %v659_v59 = vsel %vm643_vm11, %v2792_v18, 0.0  ;;  %v660_v55 = vsel %vm643_vm11, %v2795_v60, 0.0  ;;  %v960_v44 = vsel %vm643_vm11, %v2795_v60, -inf }
  0xf2   : > { %v691_v23 = vadd.f32 %v661_v10, %v659_v59  ;;  %v707_v57 = vsel %vm476_vm9, %v660_v55, 0.0  ;;  %v3007_v10 = vsel %vm476_vm9, %v680_v25, 0.0  ;;  %v3023_v55 = vsel %vm1117_vm2, 1, %v4012_v21 }
  0xf3   : > { %v1590_v25 = vmul.f32 %v2978_v27, %v2883_v33  ;;  %v1006_v38 = vsel %vm476_vm9, %v960_v44, -inf  ;;  %v709_v44 = vadd.f32 %v708_v9, %v707_v57  ;;  %v3061_v57 = vld [vmem:[%s2779_s8 + $0x60] sm:$0xff]  ;;  %vm1122_vm2 = vcmp.eq.s32.totalorder %v2746_v51, 2 }
  0xf4   : > { %1306 = vperm.xlu1 %2016, %v1289_v30   ;;  %1309 = vperm.xlu2 %2017, %v1290_v36   ;;  %v2990_v30 = vsel %vm653_vm12, %v2956_v8, 0.0  ;;  %v2998_v46 = vadd.f32 %v691_v23, %v663_v29  ;;  %v3018_v23 = vsel %vm643_vm11, %v2792_v18, -inf  ;;  %v3029_v29 = vsel %vm1115_vm5, 1, %v4012_v21  ;;  %v3052_v8 = vld [vmem:[%s2779_s8 + $0xd0] sm:$0xff] }
  0xf5   : > { %1187 = vperm.xlu0 %2015, %v1140_v39   ;;  %v2996_v39 = vld [vmem:[%s2779_s8 + $0x28] sm:$0xff]  ;;  %v991_v52 = vmax.f32 %v3018_v23, %v2841_v6  ;;  %4013 = vst [vmem:[#allocation21_spill] sm:$0xff] %v3052_v8  ;;  %v1009_v9 = vmax.f32 %v1006_v38, %v2853_v17  ;;  %v3066_v6 = vsel %vm1119_vm8, 1, %v4012_v21  ;;  %v1591_v23 = vsub.f32 1.0, %v1590_v25  ;;  %v3085_v25 = vld [vmem:[%s2779_s8 + $0x98] sm:$0xff] }
  0xf6   : > { %v615_v36 = vpop.permute.xlu1 %614  ;;  %v762_v11 = vpop.permute.xlu2 %761  ;;  %v964_v56 = vsel %vm645_vm0, %v2996_v39, -inf  ;;  %v3077_v17 = vsel %vm1120_vm3, 1, %v4012_v21  ;;  %v3095_v35 = vsel %vm656_vm4, %v3052_v8, 0.0  ;;  %vm1121_vm8 = vcmp.eq.s32.totalorder %v2714_v5, 2 }
  0xf7   : > { %vm808_vm7 = vcmp.eq.s32.totalorder %v762_v11, 1  ;;  %v3004_v59 = vpop.permute.xlu0 %611  ;;  %vm649_vm15 = vcmp.eq.s32.totalorder %v615_v36, 1  ;;  %v1008_v7 = vsel %vm476_vm9, %v964_v56, -inf  ;;  %4014 = vst [vmem:[#allocation22_spill] sm:$0xff] %v3095_v35  ;;  %v3100_v11 = vsel %vm656_vm4, %v3055_v40, 0.0  ;;  %v3110_v56 = vld [vmem:[%s2779_s8 + $0x58] sm:$0xff] }
  0xf8   : > { %v3014_v0 = vsel %vm808_vm7, %v2792_v18, 0.0  ;;  %v664_v18 = vsel %vm645_vm0, %v2996_v39, 0.0  ;;  %v825_v34 = vsel %vm808_vm7, %v2795_v60, 0.0  ;;  %v3090_v60 = vsel %vm1118_vm6, 1, %v4012_v21  ;;  %v3147_v35 = vld [vmem:[%s2779_s8 + $0x90] sm:$0xff] }
  0xf9   : > { %v710_v50 = vsel %vm476_vm9, %v664_v18, 0.0  ;;  %vm648_vm10 = vcmp.eq.s32.totalorder %v3004_v59, 1  ;;  %v671_v18 = vsel %vm649_vm15, %v3061_v57, 0.0  ;;  %v1592_v37 = vmul.f32 %v2978_v27, %v1591_v23 }
  0xfa   : > { %v672_v45 = vsel %vm649_vm15, %v3036_v15, 0.0  ;;  %v971_v26 = vsel %vm649_vm15, %v3061_v57, -inf  ;;  %vm1594_vm0 = vweird.f32 %v2883_v33  ;;  %v1598_v23 = vand.u32 2147483647, %v2883_v33 }
  0xfb   : > { %v670_v36 = vsel %vm648_vm10, %v3110_v56, 0.0  ;;  %vm3161_vm5 = vmor %vm1594_vm0, %vm1595_vm1 }
  0xfc   : > { %1315 = vperm.xlu1 %2016, %v2864_v4   ;;  %1318 = vperm.xlu2 %2017, %v2881_v47   ;;  %v972_v4 = vsel %vm649_vm15, %v3036_v15, -inf  ;;  %vm3180_vm7 = vcmp.eq.f32.partialorder %v1598_v23, 8.507059e+37 }
  0xfd   : > { %1312 = vperm.xlu0 %2015, %v2903_v43   ;;  %v711_v43 = vadd.f32 %v710_v50, %v709_v44  ;;  %v3113_v44 = vsel %vm476_vm9, %v825_v34, 0.0  ;;  %v1016_v8 = vsel %vm476_vm9, %v972_v4, -inf }
  0xfe   : > { %v3080_v47 = vpop.permute.xlu1 %623  ;;  %v3082_v38 = vpop.permute.xlu2 %770  ;;  %4015 = vst [vmem:[#allocation23_spill] sm:$0xff] %v3113_v44  ;;  %v1011_v4 = vmax.f32 %v1016_v8, %v1009_v9  ;;  %v3150_v44 = vadd.f32 %v2978_v27, %v1592_v37  ;;  %v1600_v8 = vand.u32 2147483648, %v2883_v33  ;;  %v716_v37 = vsel %vm476_vm9, %v670_v36, 0.0 }
  0xff   : > { %vm652_vm14 = vcmp.eq.s32.totalorder %v3080_v47, 1  ;;  %vm811_vm11 = vcmp.eq.s32.totalorder %v3082_v38, 1  ;;  %v3105_v20 = vpop.permute.xlu0 %620  ;;  %v713_v2 = vadd.f32 %v2836_v32, %v711_v43  ;;  %v3173_v43 = vld [vmem:[%s2779_s8 + $0xc8] sm:$0xff]  ;;  %v3178_v33 = vsel %vm1122_vm2, 1, %v4012_v21 }
 0x100   : > { %v3118_v50 = vsel %vm811_vm11, %v2782_v12, 0.0  ;;  %v978_v34 = vsel %vm652_vm14, %v3085_v25, -inf  ;;  %v977_v51 = vsel %vm652_vm14, %v3147_v35, -inf  ;;  %v1597_v5 = vsel %vm3161_vm5, %v2978_v27, %v3150_v44 }
 0x101   : > { %4016 = vst [vmem:[#allocation24_spill] sm:$0xff] %v3118_v50  ;;  %v1022_v12 = vsel %vm476_vm9, %v978_v34, -inf  ;;  %v693_v50 = vadd.f32 %v2998_v46, %v2810_v24  ;;  %v718_v34 = vsel %vm476_vm9, %v672_v45, 0.0  ;;  %v669_v24 = vsel %vm648_vm10, %v3131_v31, 0.0 }
 0x102   : > { %v1015_v32 = vmax.f32 %v1011_v4, %v1022_v12  ;;  %vm651_vm6 = vcmp.eq.s32.totalorder %v3105_v20, 1  ;;  %v3206_v36 = vsel %vm1121_vm8, 1, %v4012_v21  ;;  %v3209_v4 = vld [vmem:[%s2779_s8 + $0x80] sm:$0xff]  ;;  %v831_v27 = vsel %vm811_vm11, %v2785_v13, 0.0 }
 0x103   : > { %v678_v21 = vsel %vm652_vm14, %v3085_v25, 0.0  ;;  %v970_v38 = vsel %vm648_vm10, %v3110_v56, -inf  ;;  %v677_v45 = vsel %vm652_vm14, %v3147_v35, 0.0  ;;  %v3297_v12 = vsel %vm656_vm4, %v3055_v40, -inf }
 0x104   : > { %1324 = vperm.xlu1 %2016, %v2936_v48   ;;  %1327 = vperm.xlu2 %2017, %v2946_v62   ;;  %v694_v48 = vadd.f32 %v693_v50, %v2872_v42  ;;  %v715_v62 = vadd.f32 %v2907_v53, %v713_v2  ;;  %v1601_v53 = vor.u32 1.1754944e-38, %v1600_v8  ;;  %v1013_v50 = vmax.f32 %v1008_v7, %v1015_v32  ;;  %v3218_v8 = vld [vmem:[%s2779_s8 + $0xc0] sm:$0xff] }
 0x105   : > { %1321 = vperm.xlu0 %2015, %v2949_v3   ;;  %v992_v3 = vmax.f32 %v971_v26, %v991_v52 }
 0x106   : > { %v3168_v46 = vpop.permute.xlu1 %632  ;;  %v3170_v9 = vpop.permute.xlu2 %779  ;;  %v695_v26 = vadd.f32 %v694_v48, %v669_v24  ;;  %v717_v52 = vadd.f32 %v716_v37, %v715_v62  ;;  %v3224_v24 = vsel %vm648_vm10, %v3131_v31, -inf  ;;  %v675_v37 = vsel %vm651_vm6, %v3209_v4, 0.0 }
 0x107   : > { %vm655_vm15 = vcmp.eq.s32.totalorder %v3168_v46, 1  ;;  %vm814_vm3 = vcmp.eq.s32.totalorder %v3170_v9, 1  ;;  %v3187_v2 = vpop.permute.xlu0 %629  ;;  %v994_v44 = vmax.f32 %v992_v3, %v977_v51 }
 0x108   : > { %v3195_v42 = vsel %vm814_vm3, %v3061_v57, 0.0  ;;  %v984_v23 = vsel %vm655_vm15, %v3173_v43, -inf  ;;  %v3212_v57 = vld [vmem:[%s2779_s8 + $0x88] sm:$0xff]  ;;  %v696_v13 = vadd.f32 %v695_v26, %v671_v18  ;;  %v719_v59 = vadd.f32 %v718_v34, %v717_v52 }
 0x109   : > { %v1028_v7 = vsel %vm476_vm9, %v984_v23, -inf  ;;  %v676_v48 = vsel %vm651_vm6, %v3212_v57, 0.0  ;;  %v3244_v18 = vsel %vm476_vm9, %v831_v27, 0.0  ;;  %v724_v34 = vsel %vm476_vm9, %v678_v21, 0.0 }
 0x10a   : > { %v1017_v32 = vmax.f32 %v1013_v50, %v1028_v7  ;;  %v697_v47 = vadd.f32 %v696_v13, %v2927_v58  ;;  %v993_v51 = vmax.f32 %v3049_v14, %v994_v44  ;;  %v1014_v26 = vsel %vm476_vm9, %v970_v38, -inf  ;;  %v3276_v44 = vld [vmem:[%s2779_s8 + $0xb8] sm:$0xff]  ;;  %v3287_v13 = vld [vmem:[%s2779_s8 + $0xb0] sm:$0xff] }
 0x10b   : > { %v722_v58 = vsel %vm476_vm9, %v676_v48, 0.0  ;;  %v2154_v50 = vmov -inf   ;;  %vm654_vm11 = vcmp.eq.s32.totalorder %v3187_v2, 1  ;;  %v721_v27 = vadd.f32 %v2930_v49, %v719_v59 }
 0x10c   : > { %1333 = vperm.xlu1 %2016, %v2981_v16   ;;  %1336 = vperm.xlu2 %2017, %v3023_v55   ;;  %v983_v16 = vsel %vm655_vm15, %v3218_v8, -inf  ;;  %v1021_v55 = vmax.f32 %v1017_v32, %v3001_v54  ;;  %v698_v52 = vadd.f32 %v697_v47, %v675_v37  ;;  %483 = vst.msk [vmem:[#allocation5 + $0x8] sm:$0xff] %vm476_vm9, %v2154_v50  ;;  %v976_v38 = vsel %vm651_vm6, %v3212_v57, -inf }
 0x10d   : > { %1330 = vperm.xlu0 %2015, %v3029_v29   ;;  %v3260_v29 = vld [vmem:[%s2779_s8 + $0xf8] sm:$0xff]  ;;  %v995_v23 = vmax.f32 %v993_v51, %v983_v16  ;;  %v1602_v7 = vsel %vm3180_vm7, %v1601_v53, %v1597_v5  ;;  %v723_v37 = vadd.f32 %v722_v58, %v721_v27  ;;  %v3292_v49 = vsel %vm476_vm9, %v3100_v11, 0.0 }
 0x10e   : > { %v3252_v62 = vpop.permute.xlu1 %641  ;;  %v3254_v3 = vpop.permute.xlu2 %788  ;;  %v1019_v21 = vmax.f32 %v1014_v26, %v1021_v55  ;;  %v684_v5 = vsel %vm655_vm15, %v3173_v43, 0.0  ;;  %v682_v48 = vsel %vm654_vm11, %v3276_v44, 0.0  ;;  %v699_v59 = vadd.f32 %v698_v52, %v677_v45 }
 0x10f   : > { %vm658_vm10 = vcmp.eq.s32.totalorder %v3252_v62, 1  ;;  %vm817_vm14 = vcmp.eq.s32.totalorder %v3254_v3, 1  ;;  %v3264_v54 = vpop.permute.xlu0 %638  ;;  %v3308_v11 = vsel %vm814_vm3, %v3036_v15, 0.0  ;;  %v997_v16 = vmax.f32 %v995_v23, %v2965_v19 }
 0x110   : > { %v3272_v14 = vsel %vm817_vm14, %v3147_v35, 0.0  ;;  %v990_v32 = vsel %vm658_vm10, %v3260_v29, -inf  ;;  %v681_v55 = vsel %vm654_vm11, %v3287_v13, 0.0  ;;  %v725_v47 = vadd.f32 %v724_v34, %v723_v37  ;;  %v527_v34 = vld [vmem:[%s2779_s8 + $0xf0] sm:$0xff] }
 0x111   : > { %v1034_v35 = vsel %vm476_vm9, %v990_v32, -inf  ;;  %v683_v9 = vsel %vm655_vm15, %v3218_v8, 0.0  ;;  %vm657_vm0 = vcmp.eq.s32.totalorder %v3264_v54, 1  ;;  %v1020_v46 = vsel %vm476_vm9, %v976_v38, -inf  ;;  %v4034_v54 = vld [vmem:[#allocation21_spill] sm:$0xff] }
 0x112   : > { %v1023_v53 = vmax.f32 %v1019_v21, %v1034_v35  ;;  %v728_v51 = vsel %vm476_vm9, %v682_v48, 0.0  ;;  %v996_v50 = vmax.f32 %v3224_v24, %v997_v16  ;;  %v727_v27 = vadd.f32 %v3007_v10, %v725_v47  ;;  %v3345_v21 = vld [vmem:[%s2779_s8 + $0xe8] sm:$0xff]  ;;  %v4021_v16 = vld [vmem:[#allocation23_spill] sm:$0xff]  ;;  %v4022_v47 = vld [vmem:[#allocation22_spill] sm:$0xff] }
 0x113   : > { %v989_v38 = vsel %vm658_vm10, %v527_v34, -inf }
 0x114   : > { %1342 = vperm.xlu1 %2016, %v3066_v6   ;;  %1345 = vperm.xlu2 %2017, %v3077_v17   ;;  %v1027_v15 = vmax.f32 %v1023_v53, %v2916_v22  ;;  %v982_v6 = vsel %vm654_vm11, %v3276_v44, -inf  ;;  %v700_v17 = vadd.f32 %v699_v59, %v2990_v30  ;;  %v3333_v22 = vld [vmem:[%s2779_s8 + $0xe0] sm:$0xff]  ;;  %v729_v10 = vadd.f32 %v728_v51, %v727_v27  ;;  %v4024_v51 = vld [vmem:[#allocation24_spill] sm:$0xff] }
 0x115   : > { %1339 = vperm.xlu0 %2015, %v3090_v60   ;;  %v730_v60 = vsel %vm476_vm9, %v684_v5, 0.0  ;;  %v1026_v23 = vsel %vm476_vm9, %v982_v6, -inf }
 0x116   : > { %v768_v19 = vpop.permute.xlu1 %767  ;;  %v3326_v45 = vpop.permute.xlu2 %797  ;;  %v1025_v30 = vmax.f32 %v1020_v46, %v1027_v15  ;;  %v701_v58 = vadd.f32 %v700_v17, %v681_v55  ;;  %v731_v15 = vadd.f32 %v730_v60, %v729_v10  ;;  %v4026_v10 = vld [vmem:[#allocation13_spill] sm:$0xff] }
 0x117   : > { %vm810_vm1 = vcmp.eq.s32.totalorder %v768_v19, 1  ;;  %vm820_vm2 = vcmp.eq.s32.totalorder %v3326_v45, 1  ;;  %v765_v26 = vpop.permute.xlu0 %764  ;;  %v4023_v19 = vld [vmem:[#allocation20_spill] sm:$0xff] }
 0x118   : > { %v3339_v52 = vsel %vm820_vm2, %v3218_v8, 0.0  ;;  %v829_v32 = vsel %vm810_vm1, %v2996_v39, 0.0  ;;  %vm809_vm5 = vcmp.eq.s32.totalorder %v765_v26, 1  ;;  %v687_v8 = vsel %vm657_vm0, %v3333_v22, 0.0 }
 0x119   : > { %v826_v35 = vsel %vm809_vm5, %v2919_v63, 0.0  ;;  %v827_v24 = vsel %vm809_vm5, %v2867_v41, 0.0  ;;  %v1029_v37 = vmax.f32 %v1025_v30, %v2939_v61  ;;  %v688_v39 = vsel %vm657_vm0, %v3345_v21, 0.0 }
 0x11a   : > { %v856_v5 = vadd.f32 %v826_v35, %v3014_v0  ;;  %v872_v53 = vsel %vm476_vm9, %v827_v24, 0.0  ;;  %v702_v48 = vadd.f32 %v701_v58, %v683_v9  ;;  %v828_v59 = vsel %vm810_vm1, %v2953_v1, 0.0  ;;  %v958_v35 = vld [vmem:[#allocation5 + $0x8] sm:$0xff] }
 0x11b   : > { %v873_v55 = vadd.f32 %v872_v53, %v4021_v16  ;;  %v1033_v41 = vmax.f32 %v1029_v37, %v1026_v23  ;;  %v988_v63 = vsel %vm657_vm0, %v3345_v21, -inf  ;;  %v874_v61 = vsel %vm476_vm9, %v829_v32, 0.0  ;;  %v4025_v37 = vld [vmem:[#allocation14_spill] sm:$0xff] }
 0x11c   : > { %1351 = vperm.xlu1 %2016, %v3178_v33   ;;  %1607 = vperm.xlu2 %2017, %v1602_v7   ;;  %v857_v0 = vadd.f32 %v856_v5, %v828_v59  ;;  %v703_v9 = vadd.f32 %v702_v48, %v4022_v47  ;;  %v689_v33 = vsel %vm658_vm10, %v527_v34, 0.0  ;;  %v690_v7 = vsel %vm658_vm10, %v3260_v29, 0.0  ;;  %v4027_v59 = vld [vmem:[#allocation16_spill] sm:$0xff] }
 0x11d   : > { %1348 = vperm.xlu0 %2015, %v3206_v36   ;;  %v875_v6 = vadd.f32 %v874_v61, %v873_v55  ;;  %v1031_v46 = vmax.f32 %v4023_v19, %v1033_v41  ;;  %v998_v58 = vmax.f32 %v996_v50, %v989_v38  ;;  %v734_v23 = vsel %vm476_vm9, %v688_v39, 0.0 }
 0x11e   : > { %v777_v1 = vpop.permute.xlu1 %776  ;;  %v3372_v17 = vpop.permute.xlu2 %806  ;;  %v858_v26 = vadd.f32 %v857_v0, %v4024_v51  ;;  %v704_v60 = vadd.f32 %v703_v9, %v687_v8  ;;  %v1032_v27 = vsel %vm476_vm9, %v988_v63, -inf  ;;  %v733_v24 = vadd.f32 %v3292_v49, %v731_v15  ;;  %v578_v49 = vld [vmem:[#allocation2 + $0x8] sm:$0xff]  ;;  %v4029_v51 = vld [vmem:[#allocation15_spill] sm:$0xff] }
 0x11f   : > { %vm813_vm7 = vcmp.eq.s32.totalorder %v777_v1, 1  ;;  %vm823_vm8 = vcmp.eq.s32.totalorder %v3372_v17, 1  ;;  %v774_v36 = vpop.permute.xlu0 %773  ;;  %v877_v32 = vadd.f32 %v3244_v18, %v875_v6  ;;  %v736_v50 = vsel %vm476_vm9, %v690_v7, 0.0 }
 0x120   : > { %v3384_v30 = vsel %vm823_vm8, %v527_v34, 0.0  ;;  %v835_v62 = vsel %vm813_vm7, %v3110_v56, 0.0  ;;  %vm812_vm15 = vcmp.eq.s32.totalorder %v774_v36, 1  ;;  %v1035_v34 = vmax.f32 %v1031_v46, %v1032_v27 }
 0x121   : > { %v832_v8 = vsel %vm812_vm15, %v4025_v37, 0.0  ;;  %v833_v5 = vsel %vm812_vm15, %v4026_v10, 0.0  ;;  %v3394_v53 = vadd.f32 %v704_v60, %v689_v33  ;;  %v735_v48 = vadd.f32 %v734_v23, %v733_v24  ;;  %v3426_v10 = vld [vmem:[%s2779_s8 + $0x150] sm:$0xff] }
 0x122   : > { %v859_v38 = vadd.f32 %v858_v26, %v832_v8  ;;  %v878_v39 = vsel %vm476_vm9, %v833_v5, 0.0  ;;  %v834_v56 = vsel %vm813_vm7, %v3131_v31, 0.0  ;;  %v1000_v16 = vmax.f32 %v998_v58, %v4027_v59  ;;  %v4033_v59 = vld [vmem:[#allocation18_spill] sm:$0xff] }
 0x123   : > { %v879_v18 = vadd.f32 %v878_v39, %v877_v32  ;;  %v1036_v55 = vmax.f32 %v958_v35, %v1035_v34  ;;  %v880_v41 = vsel %vm476_vm9, %v835_v62, 0.0  ;;  %v737_v61 = vadd.f32 %v736_v50, %v735_v48 }
 0x124   : > { %v860_v63 = vadd.f32 %v859_v38, %v834_v56  ;;  %v1030_v0 = vsel %vm476_vm9, %v3297_v12, -inf  ;;  %v975_v31 = vsel %vm651_vm6, %v3209_v4, -inf  ;;  %v882_v19 = vsel %vm476_vm9, %v3308_v11, 0.0  ;;  %v4028_v12 = vld [vmem:[#allocation17_spill] sm:$0xff] }
 0x125   : > { %v881_v47 = vadd.f32 %v880_v41, %v879_v18  ;;  %v1038_v6 = vmax.f32 %v1030_v0, %v1036_v55  ;;  %v739_v7 = vadd.f32 %v737_v61, %v578_v49  ;;  %v999_v46 = vmax.f32 %v975_v31, %v1000_v16 }
 0x126   : > { %v786_v9 = vpop.permute.xlu1 %785  ;;  %v3404_v15 = vpop.permute.xlu2 %1148  ;;  %v861_v33 = vadd.f32 %v860_v63, %v3195_v42  ;;  %v973_v62 = vsel %vm650_vm13, %v4028_v12, -inf  ;;  %v981_v34 = vsel %vm654_vm11, %v3287_v13, -inf }
 0x127   : > { %v783_v1 = vpop.permute.xlu0 %782  ;;  %vm816_vm3 = vcmp.eq.s32.totalorder %v786_v9, 1  ;;  %1040 = vst.msk [vmem:[#allocation5 + $0x8] sm:$0xff] %vm476_vm9, %v1038_v6  ;;  %v883_v60 = vadd.f32 %v882_v19, %v881_v47  ;;  %v1001_v35 = vmax.f32 %v999_v46, %v973_v62  ;;  %vm1191_vm5 = vcmp.eq.s32.totalorder %v3404_v15, 1 }
 0x128   : > { %vm815_vm10 = vcmp.eq.s32.totalorder %v783_v1, 1  ;;  %741 = vst.msk [vmem:[#allocation2 + $0x8] sm:$0xff] %vm476_vm9, %v739_v7  ;;  %v840_v58 = vsel %vm816_vm3, %v3209_v4, 0.0  ;;  %v841_v11 = vsel %vm816_vm3, %v3212_v57, 0.0  ;;  %v843_v4 = vsel %vm817_vm14, %v3085_v25, 0.0  ;;  %v4031_v25 = vld [vmem:[#allocation19_spill] sm:$0xff] }
 0x129   : > { %v838_v36 = vsel %vm815_vm10, %v4028_v12, 0.0  ;;  %v839_v26 = vsel %vm815_vm10, %v4029_v51, 0.0  ;;  %v886_v24 = vsel %vm476_vm9, %v841_v11, 0.0  ;;  %v1003_v38 = vmax.f32 %v1001_v35, %v981_v34  ;;  %v3452_v1 = vld [vmem:[%s2779_s8 + $0x180] sm:$0xff] }
 0x12a   : > { %v862_v20 = vadd.f32 %v861_v33, %v838_v36  ;;  %v884_v42 = vsel %vm476_vm9, %v839_v26, 0.0  ;;  %v979_v56 = vsel %vm653_vm12, %v4031_v25, -inf  ;;  %v987_v7 = vsel %vm657_vm0, %v3333_v22, -inf  ;;  %v743_v35 = vld [vmem:[#allocation3 + $0x8] sm:$0xff] }
 0x12b   : > { %v885_v23 = vadd.f32 %v884_v42, %v883_v60 }
 0x12c   : > { %v863_v32 = vadd.f32 %v862_v20, %v840_v58  ;;  %v855_v58 = vsel %vm823_vm8, %v3260_v29, 0.0 }
 0x12d   : > { %v887_v57 = vadd.f32 %v886_v24, %v885_v23  ;;  %v900_v17 = vsel %vm476_vm9, %v855_v58, 0.0  ;;  %v3489_v24 = vld [vmem:[%s2779_s8 + $0x110] sm:$0xff] }
 0x12e   : > { %v795_v37 = vpop.permute.xlu1 %794  ;;  %v3423_v8 = vpop.permute.xlu2 %1157  ;;  %v864_v5 = vadd.f32 %v863_v32, %v3272_v14  ;;  %v888_v14 = vsel %vm476_vm9, %v843_v4, 0.0  ;;  %v3496_v4 = vld [vmem:[%s2779_s8 + $0x118] sm:$0xff] }
 0x12f   : > { %vm1194_vm13 = vcmp.eq.s32.totalorder %v3423_v8, 1  ;;  %v792_v50 = vpop.permute.xlu0 %791  ;;  %vm819_vm6 = vcmp.eq.s32.totalorder %v795_v37, 1  ;;  %v889_v49 = vadd.f32 %v888_v14, %v887_v57  ;;  %v3492_v37 = vld [vmem:[%s2779_s8 + $0x100] sm:$0xff]  ;;  %v3502_v57 = vld [vmem:[%s2779_s8 + $0x108] sm:$0xff] }
 0x130   : > { %v1513_v39 = vsel %vm1194_vm13, %v3426_v10, -inf  ;;  %vm818_vm1 = vcmp.eq.s32.totalorder %v792_v50, 1  ;;  %v847_v2 = vsel %vm819_vm6, %v3276_v44, 0.0  ;;  %v846_v61 = vsel %vm819_vm6, %v3287_v13, 0.0  ;;  %v3510_v50 = vld [vmem:[%s2779_s8 + $0x188] sm:$0xff] }
 0x131   : > { %v1002_v48 = vmax.f32 %v1513_v39, %v1003_v38  ;;  %v844_v18 = vsel %vm818_vm1, %v4031_v25, 0.0  ;;  %v845_v16 = vsel %vm818_vm1, %v4033_v59, 0.0  ;;  %v892_v47 = vsel %vm476_vm9, %v847_v2, 0.0  ;;  %v3517_v14 = vld [vmem:[%s2779_s8 + $0x128] sm:$0xff]  ;;  %v3528_v2 = vld [vmem:[%s2779_s8 + $0x120] sm:$0xff] }
 0x132   : > { %v865_v55 = vadd.f32 %v864_v5, %v844_v18  ;;  %v890_v41 = vsel %vm476_vm9, %v845_v16, 0.0  ;;  %v849_v44 = vsel %vm820_vm2, %v3173_v43, 0.0  ;;  %v3531_v18 = vld [vmem:[%s2779_s8 + $0x158] sm:$0xff]  ;;  %v985_v59 = vsel %vm656_vm4, %v4034_v54, -inf  ;;  %v3537_v16 = vld [vmem:[%s2779_s8 + $0x130] sm:$0xff]  ;;  %v3647_v8 = vld [vmem:[%s2779_s8 + $0x168] sm:$0xff] }
 0x133   : > { %v1004_v63 = vmax.f32 %v1002_v48, %v979_v56  ;;  %v891_v0 = vadd.f32 %v890_v41, %v889_v49  ;;  %v894_v12 = vsel %vm476_vm9, %v849_v44, 0.0  ;;  %v1210_v41 = vsel %vm1191_vm5, %v3517_v14, 0.0 }
 0x134   : > { %v866_v9 = vadd.f32 %v865_v55, %v846_v61  ;;  %v3543_v55 = vld [vmem:[%s2779_s8 + $0x1b8] sm:$0xff] }
 0x135   : > { %v893_v33 = vadd.f32 %v892_v47, %v891_v0  ;;  %v1005_v19 = vmax.f32 %v987_v7, %v1004_v63  ;;  %4036 = vst [vmem:[#allocation22_spill] sm:$0xff] %v3543_v55  ;;  %v3556_v0 = vld [vmem:[%s2779_s8 + $0x138] sm:$0xff]  ;;  %v1209_v47 = vsel %vm1191_vm5, %v3528_v2, 0.0 }
 0x136   : > { %v804_v6 = vpop.permute.xlu1 %803  ;;  %v3449_v31 = vpop.permute.xlu2 %1166  ;;  %v867_v43 = vadd.f32 %v866_v9, %v3339_v52  ;;  %v1514_v9 = vsel %vm1194_vm13, %v3531_v18, -inf }
 0x137   : > { %vm1197_vm12 = vcmp.eq.s32.totalorder %v3449_v31, 1  ;;  %v801_v13 = vpop.permute.xlu0 %800  ;;  %vm822_vm14 = vcmp.eq.s32.totalorder %v804_v6, 1  ;;  %v895_v60 = vadd.f32 %v894_v12, %v893_v33  ;;  %v3565_v6 = vld [vmem:[%s2779_s8 + $0x1e8] sm:$0xff]  ;;  %v1255_v12 = vsel %vm476_vm9, %v1210_v41, 0.0 }
 0x138   : > { %v1519_v46 = vsel %vm1197_vm12, %v3452_v1, -inf  ;;  %vm821_vm11 = vcmp.eq.s32.totalorder %v801_v13, 1  ;;  %v853_v45 = vsel %vm822_vm14, %v3345_v21, 0.0  ;;  %v852_v11 = vsel %vm822_vm14, %v3333_v22, 0.0  ;;  %4037 = vst [vmem:[#allocation20_spill] sm:$0xff] %v3565_v6 }
 0x139   : > { %v3465_v36 = vmax.f32 %v1519_v46, %v1005_v19  ;;  %v850_v51 = vsel %vm821_vm11, %v4034_v54, 0.0  ;;  %v851_v26 = vsel %vm821_vm11, %v3055_v40, 0.0  ;;  %v898_v52 = vsel %vm476_vm9, %v853_v45, 0.0  ;;  %v3577_v19 = vld [vmem:[%s2779_s8 + $0x1e0] sm:$0xff] }
 0x13a   : > { %v868_v20 = vadd.f32 %v867_v43, %v850_v51  ;;  %v896_v42 = vsel %vm476_vm9, %v851_v26, 0.0  ;;  %v1520_v49 = vsel %vm1197_vm12, %v3510_v50, -inf  ;;  %4038 = vst [vmem:[#allocation24_spill] sm:$0xff] %v3577_v19  ;;  %v3580_v46 = vld [vmem:[%s2779_s8 + $0x140] sm:$0xff]  ;;  %v1558_v26 = vsel %vm476_vm9, %v1514_v9, -inf }
 0x13b   : > { %v897_v23 = vadd.f32 %v896_v42, %v895_v60  ;;  %v1564_v7 = vsel %vm476_vm9, %v1520_v49, -inf  ;;  %v1538_v60 = vmax.f32 %v3465_v36, %v985_v59  ;;  %v1222_v59 = vsel %vm1197_vm12, %v3510_v50, 0.0 }
 0x13c   : > { %v869_v21 = vadd.f32 %v868_v20, %v852_v11  ;;  %v1508_v11 = vsel %vm1191_vm5, %v3517_v14, -inf }
 0x13d   : > { %v899_v62 = vadd.f32 %v898_v52, %v897_v23  ;;  %v1555_v23 = vmax.f32 %v1564_v7, %v1558_v26 }
 0x13e   : > { %v3477_v27 = vpop.permute.xlu1 %1145  ;;  %v3479_v40 = vpop.permute.xlu2 %1175  ;;  %v3485_v29 = vadd.f32 %v869_v21, %v3384_v30 }
 0x13f   : > { %v3481_v32 = vpop.permute.xlu0 %1142  ;;  %v901_v22 = vadd.f32 %v900_v17, %v899_v62  ;;  %vm1190_vm0 = vcmp.eq.s32.totalorder %v3477_v27, 1  ;;  %vm1200_vm7 = vcmp.eq.s32.totalorder %v3479_v40, 1 }
 0x140   : > { %4035 = vst [vmem:[#allocation23_spill] sm:$0xff] %v3485_v29  ;;  %vm1189_vm2 = vcmp.eq.s32.totalorder %v3481_v32, 1  ;;  %v1207_v30 = vsel %vm1190_vm0, %v3489_v24, 0.0  ;;  %v1208_v25 = vsel %vm1190_vm0, %v3496_v4, 0.0  ;;  %v1526_v13 = vsel %vm1200_vm7, %v3543_v55, -inf }
 0x141   : > { %v903_v5 = vadd.f32 %v901_v22, %v743_v35  ;;  %v1205_v34 = vsel %vm1189_vm2, %v3492_v37, 0.0  ;;  %v1206_v3 = vsel %vm1189_vm2, %v3502_v57, 0.0  ;;  %v1253_v63 = vsel %vm476_vm9, %v1208_v25, 0.0  ;;  %v3612_v35 = vld [vmem:[%s2779_s8 + $0x148] sm:$0xff] }
 0x142   : > { %v1237_v56 = vadd.f32 %v1207_v30, %v1205_v34  ;;  %v1252_v61 = vsel %vm476_vm9, %v1206_v3, 0.0  ;;  %v1525_v43 = vsel %vm1200_vm7, %v3551_v28, -inf  ;;  %v1570_v52 = vsel %vm476_vm9, %v1526_v13, -inf }
 0x143   : > { %905 = vst.msk [vmem:[#allocation3 + $0x8] sm:$0xff] %vm476_vm9, %v903_v5  ;;  %v1254_v45 = vadd.f32 %v1253_v63, %v1252_v61  ;;  %v1540_v17 = vmax.f32 %v1538_v60, %v1525_v43  ;;  %v3616_v5 = vld [vmem:[%s2779_s8 + $0x160] sm:$0xff]  ;;  %v1216_v34 = vsel %vm1194_vm13, %v3531_v18, 0.0  ;;  %v1559_v49 = vmax.f32 %v1555_v23, %v1570_v52 }
 0x144   : > { %v1238_v33 = vadd.f32 %v1237_v56, %v1209_v47  ;;  %v3625_v56 = vsel %vm1191_vm5, %v3528_v2, -inf  ;;  %v3631_v63 = vsel %vm476_vm9, %v1508_v11, -inf  ;;  %v1215_v61 = vsel %vm1194_vm13, %v3426_v10, 0.0  ;;  %v3671_v11 = vld [vmem:[%s2779_s8 + $0x170] sm:$0xff] }
 0x145   : > { %v1256_v3 = vadd.f32 %v1255_v12, %v1254_v45  ;;  %v1506_v7 = vsel %vm1190_vm0, %v3496_v4, -inf  ;;  %v1221_v12 = vsel %vm1197_vm12, %v3452_v1, 0.0  ;;  %v3653_v43 = vsel %vm476_vm9, %v1222_v59, 0.0  ;;  %v3697_v59 = vld [vmem:[%s2779_s8 + $0x178] sm:$0xff] }
 0x146   : > { %v3512_v38 = vpop.permute.xlu1 %1154  ;;  %v3514_v39 = vpop.permute.xlu2 %1184  ;;  %v1228_v45 = vsel %vm1200_vm7, %v3543_v55, 0.0  ;;  %v3676_v27 = vsel %vm1200_vm7, %v3551_v28, 0.0  ;;  %v1551_v52 = vsel %vm476_vm9, %v1506_v7, -inf }
 0x147   : > { %v3519_v48 = vpop.permute.xlu0 %1151  ;;  %vm1203_vm4 = vcmp.eq.s32.totalorder %v3514_v39, 1  ;;  %vm1193_vm15 = vcmp.eq.s32.totalorder %v3512_v38, 1 }
 0x148   : > { %vm1192_vm8 = vcmp.eq.s32.totalorder %v3519_v48, 1  ;;  %v1532_v20 = vsel %vm1203_vm4, %v3565_v6, -inf  ;;  %v1531_v21 = vsel %vm1203_vm4, %v3577_v19, -inf  ;;  %v1213_v62 = vsel %vm1193_vm15, %v3580_v46, 0.0 }
 0x149   : > { %v1211_v44 = vsel %vm1192_vm8, %v3537_v16, 0.0  ;;  %v1212_v54 = vsel %vm1192_vm8, %v3556_v0, 0.0  ;;  %v1576_v25 = vsel %vm476_vm9, %v1532_v20, -inf  ;;  %v1542_v41 = vmax.f32 %v1540_v17, %v1531_v21  ;;  %v3668_v20 = vld [vmem:[%s2779_s8 + $0x190] sm:$0xff] }
 0x14a   : > { %v1239_v51 = vadd.f32 %v1238_v33, %v1211_v44  ;;  %v1257_v22 = vsel %vm476_vm9, %v1212_v54, 0.0  ;;  %v1214_v47 = vsel %vm1193_vm15, %v3612_v35, 0.0  ;;  %v1261_v44 = vsel %vm476_vm9, %v1216_v34, 0.0 }
 0x14b   : > { %v1258_v15 = vadd.f32 %v1257_v22, %v1256_v3  ;;  %v1563_v33 = vmax.f32 %v1559_v49, %v1576_v25  ;;  %v1505_v54 = vsel %vm1190_vm0, %v3489_v24, -inf  ;;  %v1259_v31 = vsel %vm476_vm9, %v1214_v47, 0.0 }
 0x14c   : > { %v1240_v30 = vadd.f32 %v1239_v51, %v1213_v62  ;;  %v1544_v51 = vmax.f32 %v1542_v41, %v1505_v54  ;;  %v3680_v62 = vld [vmem:[%s2779_s8 + $0x198] sm:$0xff]  ;;  %v1512_v40 = vsel %vm1193_vm15, %v3612_v35, -inf  ;;  %v1511_v25 = vsel %vm1193_vm15, %v3580_v46, -inf }
 0x14d   : > { %v1260_v22 = vadd.f32 %v1259_v31, %v1258_v15  ;;  %v1567_v34 = vmax.f32 %v1563_v33, %v1551_v52  ;;  %v1504_v41 = vsel %vm1189_vm2, %v3502_v57, -inf  ;;  %v1556_v33 = vsel %vm476_vm9, %v1512_v40, -inf }
 0x14e   : > { %v3594_v42 = vpop.permute.xlu1 %1163  ;;  %v3596_v58 = vpop.permute.xlu2 %1309  ;;  %v1241_v13 = vadd.f32 %v1240_v30, %v1215_v61  ;;  %v3686_v30 = vsel %vm476_vm9, %v1228_v45, 0.0  ;;  %v1546_v61 = vmax.f32 %v1544_v51, %v1511_v25  ;;  %v3719_v31 = vsel %vm1189_vm2, %v3492_v37, -inf  ;;  %v3742_v25 = vld [vmem:[%s2779_s8 + $0x1c0] sm:$0xff] }
 0x14f   : > { %v3605_v36 = vpop.permute.xlu0 %1160  ;;  %vm1196_vm10 = vcmp.eq.s32.totalorder %v3594_v42, 1  ;;  %v1571_v45 = vmax.f32 %v1567_v34, %v1556_v33  ;;  %v3729_v52 = vsel %vm476_vm9, %v1504_v41, -inf  ;;  %4039 = vst [vmem:[#allocation14_spill] sm:$0xff] %v3742_v25  ;;  %vm1354_vm6 = vcmp.eq.s32.totalorder %v3596_v58, 1  ;;  %v3800_v58 = vld [vmem:[%s2779_s8 + $0x1d0] sm:$0xff] }
 0x150   : > { %vm1195_vm3 = vcmp.eq.s32.totalorder %v3605_v36, 1  ;;  %v1219_v49 = vsel %vm1196_vm10, %v3671_v11, 0.0  ;;  %v1220_v51 = vsel %vm1196_vm10, %v3697_v59, 0.0  ;;  %v1518_v39 = vsel %vm1196_vm10, %v3697_v59, -inf  ;;  %v3821_v36 = vld [vmem:[%s2779_s8 + $0x1f0] sm:$0xff] }
 0x151   : > { %v1217_v9 = vsel %vm1195_vm3, %v3616_v5, 0.0  ;;  %v1218_v17 = vsel %vm1195_vm3, %v3647_v8, 0.0  ;;  %v1517_v41 = vsel %vm1196_vm10, %v3671_v11, -inf  ;;  %v1562_v42 = vsel %vm476_vm9, %v1518_v39, -inf }
 0x152   : > { %v1242_v23 = vadd.f32 %v1241_v13, %v1217_v9  ;;  %v1263_v38 = vsel %vm476_vm9, %v1218_v17, 0.0  ;;  %v1234_v9 = vsel %vm1203_vm4, %v3565_v6, 0.0  ;;  %v1262_v13 = vadd.f32 %v1261_v44, %v1260_v22  ;;  %v3824_v6 = vld [vmem:[%s2779_s8 + $0x1f8] sm:$0xff] }
 0x153   : > { %v3732_v22 = vsel %vm476_vm9, %v1234_v9, 0.0 }
 0x154   : > { %v1243_v15 = vadd.f32 %v1242_v23, %v1219_v49  ;;  %v3724_v23 = vsel %vm1203_vm4, %v3577_v19, 0.0  ;;  %v1264_v17 = vadd.f32 %v1263_v38, %v1262_v13  ;;  %v1265_v49 = vsel %vm476_vm9, %v1220_v51, 0.0 }
 0x155   : > { %v1510_v38 = vsel %vm1192_vm8, %v3556_v0, -inf }
 0x156   : > { %v3662_v26 = vpop.permute.xlu1 %1172  ;;  %v3664_v60 = vpop.permute.xlu2 %1318  ;;  %v1266_v13 = vadd.f32 %v1265_v49, %v1264_v17  ;;  %v1509_v17 = vsel %vm1192_vm8, %v3537_v16, -inf  ;;  %v1516_v49 = vsel %vm1195_vm3, %v3647_v8, -inf }
 0x157   : > { %v1170_v21 = vpop.permute.xlu0 %1169  ;;  %vm1199_vm1 = vcmp.eq.s32.totalorder %v3662_v26, 1  ;;  %vm1357_vm2 = vcmp.eq.s32.totalorder %v3664_v60, 1 }
 0x158   : > { %vm1198_vm13 = vcmp.eq.s32.totalorder %v1170_v21, 1 }
 0x159   : > { %v1521_v3 = vsel %vm1198_vm13, %v3668_v20, -inf  ;;  %v1522_v47 = vsel %vm1198_vm13, %v3680_v62, -inf  ;;  %v1223_v44 = vsel %vm1198_vm13, %v3668_v20, 0.0  ;;  %v1224_v33 = vsel %vm1198_vm13, %v3680_v62, 0.0 }
 0x15a   : > { %v1566_v7 = vsel %vm476_vm9, %v1522_v47, -inf  ;;  %v1548_v54 = vmax.f32 %v1546_v61, %v1521_v3  ;;  %v1244_v3 = vadd.f32 %v1243_v15, %v1221_v12  ;;  %v3750_v47 = vld [vmem:[%s2779_s8 + $0x1c8] sm:$0xff]  ;;  %v3757_v12 = vld [vmem:[%s2779_s8 + $0x1a0] sm:$0xff] }
 0x15b   : > { %v1575_v32 = vmax.f32 %v1571_v45, %v1566_v7  ;;  %v1372_v45 = vsel %vm1354_vm6, %v3496_v4, 0.0  ;;  %v1554_v4 = vsel %vm476_vm9, %v1510_v38, -inf  ;;  %v1268_v38 = vadd.f32 %v3653_v43, %v1266_v13 }
 0x15c   : > { %v1535_v9 = vmax.f32 %v1517_v41, %v1548_v54  ;;  %v1245_v15 = vadd.f32 %v1244_v3, %v1223_v44  ;;  %v3770_v41 = vld [vmem:[%s2779_s8 + $0x1a8] sm:$0xff]  ;;  %v1225_v44 = vsel %vm1199_vm1, %v3757_v12, 0.0  ;;  %v3808_v43 = vsel %vm1195_vm3, %v3616_v5, -inf }
 0x15d   : > { %v1579_v51 = vmax.f32 %v1575_v32, %v1562_v42  ;;  %v1269_v32 = vsel %vm476_vm9, %v1224_v33, 0.0  ;;  %v1417_v42 = vsel %vm476_vm9, %v1372_v45, 0.0  ;;  %v1226_v48 = vsel %vm1199_vm1, %v3770_v41, 0.0  ;;  %v3803_v45 = vld [vmem:[%s2779_s8 + $0x1d8] sm:$0xff] }
 0x15e   : > { %v3734_v34 = vpop.permute.xlu1 %1181  ;;  %v3736_v40 = vpop.permute.xlu2 %1327  ;;  %v1246_v3 = vadd.f32 %v1245_v15, %v1225_v44  ;;  %v1523_v44 = vsel %vm1199_vm1, %v3757_v12, -inf }
 0x15f   : > { %v1179_v61 = vpop.permute.xlu0 %1178  ;;  %vm1202_vm14 = vcmp.eq.s32.totalorder %v3734_v34, 1  ;;  %vm1360_vm15 = vcmp.eq.s32.totalorder %v3736_v40, 1 }
 0x160   : > { %vm1201_vm12 = vcmp.eq.s32.totalorder %v1179_v61, 1  ;;  %v1247_v19 = vadd.f32 %v1246_v3, %v3676_v27  ;;  %v1232_v26 = vsel %vm1202_vm14, %v3803_v45, 0.0 }
 0x161   : > { %v1527_v7 = vsel %vm1201_vm12, %v3742_v25, -inf  ;;  %v1528_v54 = vsel %vm1201_vm12, %v3750_v47, -inf  ;;  %v1229_v13 = vsel %vm1201_vm12, %v3742_v25, 0.0 }
 0x162   : > { %v1537_v29 = vmax.f32 %v1535_v9, %v1527_v7  ;;  %v1572_v21 = vsel %vm476_vm9, %v1528_v54, -inf  ;;  %v1371_v9 = vsel %vm1354_vm6, %v3489_v24, 0.0  ;;  %v1524_v24 = vsel %vm1199_vm1, %v3770_v41, -inf }
 0x163   : > { %v1553_v39 = vmax.f32 %v1572_v21, %v1579_v51  ;;  %v1270_v51 = vadd.f32 %v1269_v32, %v1268_v38  ;;  %v3814_v54 = vsel %vm476_vm9, %v1516_v49, -inf  ;;  %v1271_v21 = vsel %vm476_vm9, %v1226_v48, 0.0 }
 0x164   : > { %v1539_v33 = vmax.f32 %v1537_v29, %v3719_v31  ;;  %v1568_v32 = vsel %vm476_vm9, %v1524_v24, -inf  ;;  %v1248_v48 = vadd.f32 %v1247_v19, %v1229_v13 }
 0x165   : > { %v1557_v29 = vmax.f32 %v1553_v39, %v3729_v52  ;;  %v1230_v52 = vsel %vm1201_vm12, %v3750_v47, 0.0  ;;  %v1231_v39 = vsel %vm1202_vm14, %v3800_v58, 0.0  ;;  %v1272_v38 = vadd.f32 %v1271_v21, %v1270_v51 }
 0x166   : > { %v1307_v15 = vpop.permute.xlu1 %1306  ;;  %v3794_v7 = vpop.permute.xlu2 %1336  ;;  %v1541_v49 = vmax.f32 %v1539_v33, %v1523_v44  ;;  %v1275_v25 = vsel %vm476_vm9, %v1230_v52, 0.0  ;;  %v1249_v44 = vadd.f32 %v1248_v48, %v1231_v39  ;;  %v1277_v39 = vsel %vm476_vm9, %v1232_v26, 0.0 }
 0x167   : > { %v1188_v31 = vpop.permute.xlu0 %1187  ;;  %vm1353_vm11 = vcmp.eq.s32.totalorder %v1307_v15, 1  ;;  %v1561_v61 = vmax.f32 %v1557_v29, %v1568_v32  ;;  %v1274_v29 = vadd.f32 %v3686_v30, %v1272_v38  ;;  %v1529_v30 = vsel %vm1202_vm14, %v3800_v58, -inf }
 0x168   : > { %vm1204_vm0 = vcmp.eq.s32.totalorder %v1188_v31, 1  ;;  %v1370_v27 = vsel %vm1353_vm11, %v3502_v57, 0.0  ;;  %v1369_v19 = vsel %vm1353_vm11, %v3492_v37, 0.0  ;;  %v1530_v57 = vsel %vm1202_vm14, %v3803_v45, -inf }
 0x169   : > { %v1533_v3 = vsel %vm1204_vm0, %v3821_v36, -inf  ;;  %v1534_v24 = vsel %vm1204_vm0, %v3824_v6, -inf  ;;  %v1416_v51 = vsel %vm476_vm9, %v1370_v27, 0.0  ;;  %v1236_v21 = vsel %vm1204_vm0, %v3824_v6, 0.0 }
 0x16a   : > { %v1543_v55 = vmax.f32 %v1541_v49, %v1533_v3  ;;  %v1578_v33 = vsel %vm476_vm9, %v1534_v24, -inf  ;;  %v1235_v37 = vsel %vm1204_vm0, %v3821_v36, 0.0  ;;  %v1401_v3 = vadd.f32 %v1371_v9, %v1369_v19 }
 0x16b   : > { %v1565_v13 = vmax.f32 %v1561_v61, %v1578_v33  ;;  %v1276_v61 = vadd.f32 %v1275_v25, %v1274_v29  ;;  %v1574_v38 = vsel %vm476_vm9, %v1530_v57, -inf  ;;  %v1281_v27 = vsel %vm476_vm9, %v1236_v21, 0.0  ;;  %v1502_v57 = vld [vmem:[#allocation5 + $0x8] sm:$0xff] }
 0x16c   : > { %v1545_v32 = vmax.f32 %v1543_v55, %v1509_v17  ;;  %v1250_v55 = vadd.f32 %v1249_v44, %v3724_v23  ;;  %v1418_v17 = vadd.f32 %v1417_v42, %v1416_v51  ;;  %vm1363_vm13 = vcmp.eq.s32.totalorder %v3794_v7, 1 }
 0x16d   : > { %v1569_v15 = vmax.f32 %v1565_v13, %v1554_v4  ;;  %v1278_v25 = vadd.f32 %v1277_v39, %v1276_v61  ;;  %v1124_v39 = vld [vmem:[#allocation2 + $0x8] sm:$0xff] }
 0x16e   : > { %v1316_v52 = vpop.permute.xlu1 %1315  ;;  %v3854_v49 = vpop.permute.xlu2 %1345  ;;  %v1547_v26 = vmax.f32 %v1545_v32, %v1529_v30  ;;  %v1251_v4 = vadd.f32 %v1250_v55, %v1235_v37 }
 0x16f   : > { %vm1356_vm5 = vcmp.eq.s32.totalorder %v1316_v52, 1  ;;  %v1313_v48 = vpop.permute.xlu0 %1312  ;;  %v1573_v24 = vmax.f32 %v1569_v15, %v1574_v38  ;;  %v1280_v44 = vadd.f32 %v3732_v22, %v1278_v25  ;;  %vm1366_vm12 = vcmp.eq.s32.totalorder %v3854_v49, 1 }
 0x170   : > { %v1376_v31 = vsel %vm1356_vm5, %v3556_v0, 0.0  ;;  %vm1355_vm7 = vcmp.eq.s32.totalorder %v1313_v48, 1  ;;  %v1549_v33 = vmax.f32 %v1547_v26, %v3625_v56  ;;  %v1283_v13 = vadd.f32 %v1251_v4, %v3394_v53 }
 0x171   : > { %v1373_v9 = vsel %vm1355_vm7, %v3528_v2, 0.0  ;;  %v1374_v34 = vsel %vm1355_vm7, %v3517_v14, 0.0  ;;  %v1577_v19 = vmax.f32 %v1573_v24, %v3631_v63  ;;  %v1375_v0 = vsel %vm1356_vm5, %v3537_v16, 0.0 }
 0x172   : > { %v1402_v23 = vadd.f32 %v1401_v3, %v1373_v9  ;;  %v1419_v42 = vsel %vm476_vm9, %v1374_v34, 0.0  ;;  %v1581_v2 = vmax.f32 %v3808_v43, %v1549_v33  ;;  %v1378_v14 = vsel %vm1357_vm2, %v3612_v35, 0.0 }
 0x173   : > { %v1420_v29 = vadd.f32 %v1419_v42, %v1418_v17  ;;  %v1580_v51 = vmax.f32 %v1577_v19, %v1502_v57  ;;  %v1421_v56 = vsel %vm476_vm9, %v1376_v31, 0.0  ;;  %v1282_v22 = vadd.f32 %v1281_v27, %v1280_v44 }
 0x174   : > { %v1403_v63 = vadd.f32 %v1402_v23, %v1375_v0  ;;  %v1377_v43 = vsel %vm1357_vm2, %v3580_v46, 0.0  ;;  %1881 = vst [vmem:[%s2831_s15 + $0x30] sm:$0xff] %v1581_v2  ;;  %v1423_v35 = vsel %vm476_vm9, %v1378_v14, 0.0  ;;  %v1389_v57 = vsel %vm1363_vm13, %v3757_v12, 0.0  ;;  %v4040_v2 = vld [vmem:[#allocation22_spill] sm:$0xff] }
 0x175   : > { %v1422_v53 = vadd.f32 %v1421_v56, %v1420_v29  ;;  %v1582_v16 = vmax.f32 %v3814_v54, %v1580_v51  ;;  %v1284_v15 = vadd.f32 %v1282_v22, %v1124_v39  ;;  %v1396_v39 = vsel %vm1366_vm12, %v3803_v45, 0.0 }
 0x176   : > { %v1325_v21 = vpop.permute.xlu1 %1324  ;;  %v1608_v32 = vpop.permute.xlu2 %1607  ;;  %v1404_v3 = vadd.f32 %v1403_v63, %v1377_v43 }
 0x177   : > { %vm1359_vm8 = vcmp.eq.s32.totalorder %v1325_v21, 1  ;;  %v1610_v52 = vmul.f32 %v1608_v32, %v1283_v13  ;;  %v1322_v37 = vpop.permute.xlu0 %1321  ;;  %1584 = vst.msk [vmem:[#allocation5 + $0x8] sm:$0xff] %vm476_vm9, %v1582_v16  ;;  %v1424_v46 = vadd.f32 %v1423_v35, %v1422_v53  ;;  %v4041_v21 = vld [vmem:[#allocation14_spill] sm:$0xff] }
 0x178   : > { %vm1358_vm4 = vcmp.eq.s32.totalorder %v1322_v37, 1  ;;  %v1382_v54 = vsel %vm1359_vm8, %v3647_v8, 0.0  ;;  %1286 = vst.msk [vmem:[#allocation2 + $0x8] sm:$0xff] %vm476_vm9, %v1284_v15  ;;  %v1381_v38 = vsel %vm1359_vm8, %v3616_v5, 0.0  ;;  %v1383_v8 = vsel %vm1360_vm15, %v3671_v11, 0.0  ;;  %v4042_v15 = vld [vmem:[#allocation24_spill] sm:$0xff] }
 0x179   : > { %v1379_v48 = vsel %vm1358_vm4, %v3426_v10, 0.0  ;;  %v1380_v61 = vsel %vm1358_vm4, %v3531_v18, 0.0  ;;  %1877 = vst [vmem:[%s2831_s15 + $0x10] sm:$0xff] %v1610_v52  ;;  %v1384_v10 = vsel %vm1360_vm15, %v3697_v59, 0.0  ;;  %v1427_v18 = vsel %vm476_vm9, %v1382_v54, 0.0 }
 0x17a   : > { %v1425_v60 = vsel %vm476_vm9, %v1380_v61, 0.0  ;;  %v1405_v30 = vadd.f32 %v1404_v3, %v1379_v48  ;;  %v1429_v24 = vsel %vm476_vm9, %v1384_v10, 0.0  ;;  %v1441_v37 = vsel %vm476_vm9, %v1396_v39, 0.0  ;;  %v4043_v48 = vld [vmem:[#allocation20_spill] sm:$0xff] }
 0x17b   : > { %v1426_v55 = vadd.f32 %v1425_v60, %v1424_v46 }
 0x17c   : > { %v1406_v40 = vadd.f32 %v1405_v30, %v1381_v38 }
 0x17d   : > { %v1428_v17 = vadd.f32 %v1427_v18, %v1426_v55  ;;  %v4044_v55 = vld [vmem:[#allocation23_spill] sm:$0xff] }
 0x17e   : > { %v1334_v27 = vpop.permute.xlu1 %1333  ;;  %v1407_v31 = vadd.f32 %v1406_v40, %v1383_v8  ;;  %v1621_v4 = vld [vmem:[#allocation5 + $0x8] sm:$0xff] }
 0x17f   : > { %vm1362_vm3 = vcmp.eq.s32.totalorder %v1334_v27, 1  ;;  %v1331_v26 = vpop.permute.xlu0 %1330  ;;  %v1604_v5 = vld [vmem:[#allocation2 + $0x8] sm:$0xff]  ;;  %v1430_v34 = vadd.f32 %v1429_v24, %v1428_v17  ;;  %1882 = vst.msk [vmem:[%s2831_s15 + $0x38] sm:$0xff] %vm476_vm9, %v1621_v4 }
 0x180   : > { %vm1361_vm10 = vcmp.eq.s32.totalorder %v1331_v26, 1  ;;  %v1388_v59 = vsel %vm1362_vm3, %v3680_v62, 0.0  ;;  %v1611_v11 = vmul.f32 %v1608_v32, %v1604_v5  ;;  %v1387_v23 = vsel %vm1362_vm3, %v3668_v20, 0.0 }
 0x181   : > { %v1385_v25 = vsel %vm1361_vm10, %v3452_v1, 0.0  ;;  %v1386_v9 = vsel %vm1361_vm10, %v3510_v50, 0.0  ;;  %v1433_v62 = vsel %vm476_vm9, %v1388_v59, 0.0  ;;  %v1390_v50 = vsel %vm1363_vm13, %v3770_v41, 0.0 }
 0x182   : > { %v1408_v33 = vadd.f32 %v1407_v31, %v1385_v25  ;;  %v1431_v19 = vsel %vm476_vm9, %v1386_v9, 0.0  ;;  %1878 = vst.msk [vmem:[%s2831_s15 + $0x18] sm:$0xff] %vm476_vm9, %v1611_v11  ;;  %v1435_v0 = vsel %vm476_vm9, %v1390_v50, 0.0 }
 0x183   : > { %v1432_v42 = vadd.f32 %v1431_v19, %v1430_v34 }
 0x184   : > { %v1409_v1 = vadd.f32 %v1408_v33, %v1387_v23 }
 0x185   : > { %v1434_v44 = vadd.f32 %v1433_v62, %v1432_v42 }
 0x186   : > { %v1343_v13 = vpop.permute.xlu1 %1342  ;;  %v1410_v29 = vadd.f32 %v1409_v1, %v1389_v57 }
 0x187   : > { %vm1365_vm6 = vcmp.eq.s32.totalorder %v1343_v13, 1  ;;  %v1340_v7 = vpop.permute.xlu0 %1339  ;;  %v1436_v56 = vadd.f32 %v1435_v0, %v1434_v44 }
 0x188   : > { %vm1364_vm1 = vcmp.eq.s32.totalorder %v1340_v7, 1  ;;  %v1394_v20 = vsel %vm1365_vm6, %v3750_v47, 0.0  ;;  %v1393_v12 = vsel %vm1365_vm6, %v4041_v21, 0.0 }
 0x189   : > { %v1391_v51 = vsel %vm1364_vm1, %v3551_v28, 0.0  ;;  %v1392_v14 = vsel %vm1364_vm1, %v4040_v2, 0.0  ;;  %v1439_v32 = vsel %vm476_vm9, %v1394_v20, 0.0  ;;  %v1395_v28 = vsel %vm1366_vm12, %v3800_v58, 0.0 }
 0x18a   : > { %v1411_v41 = vadd.f32 %v1410_v29, %v1391_v51  ;;  %v1437_v63 = vsel %vm476_vm9, %v1392_v14, 0.0 }
 0x18b   : > { %v1438_v22 = vadd.f32 %v1437_v63, %v1436_v56 }
 0x18c   : > { %v1412_v53 = vadd.f32 %v1411_v41, %v1393_v12 }
 0x18d   : > { %v1440_v16 = vadd.f32 %v1439_v32, %v1438_v22 }
 0x18e   : > { %v1352_v47 = vpop.permute.xlu1 %1351  ;;  %v1413_v49 = vadd.f32 %v1412_v53, %v1395_v28 }
 0x18f   : > { %vm1368_vm14 = vcmp.eq.s32.totalorder %v1352_v47, 1  ;;  %v1349_v52 = vpop.permute.xlu0 %1348  ;;  %v1442_v45 = vadd.f32 %v1441_v37, %v1440_v16 }
 0x190   : > { %vm1367_vm11 = vcmp.eq.s32.totalorder %v1349_v52, 1  ;;  %v1400_v43 = vsel %vm1368_vm14, %v3824_v6, 0.0  ;;  %v1399_v58 = vsel %vm1368_vm14, %v3821_v36, 0.0  ;;  %v1288_v6 = vld [vmem:[#allocation3 + $0x8] sm:$0xff] }
 0x191   : > { %v1397_v35 = vsel %vm1367_vm11, %v4042_v15, 0.0  ;;  %v1398_v61 = vsel %vm1367_vm11, %v4043_v48, 0.0  ;;  %v1445_v60 = vsel %vm476_vm9, %v1400_v43, 0.0 }
 0x192   : > { %v1414_v3 = vadd.f32 %v1413_v49, %v1397_v35  ;;  %v1443_v54 = vsel %vm476_vm9, %v1398_v61, 0.0 }
 0x193   : > { %v1444_v46 = vadd.f32 %v1443_v54, %v1442_v45 }
 0x194   : > { %v1415_v30 = vadd.f32 %v1414_v3, %v1399_v58 }
 0x195   : > { %v1446_v38 = vadd.f32 %v1445_v60, %v1444_v46 }
 0x196   : > { %v1447_v10 = vadd.f32 %v1415_v30, %v4044_v55 }
 0x197   : > { %v1448_v18 = vadd.f32 %v1446_v38, %v1288_v6 }
 0x198   : > { %1879 = vst [vmem:[%s2831_s15 + $0x20] sm:$0xff] %v1447_v10 }
 0x199   : > { %1450 = vst.msk [vmem:[#allocation3 + $0x8] sm:$0xff] %vm476_vm9, %v1448_v18 }
 0x1a0   : > { %v1616_v36 = vld [vmem:[#allocation3 + $0x8] sm:$0xff] }
 0x1a1   : > { %1880 = vst.msk [vmem:[%s2831_s15 + $0x28] sm:$0xff] %vm476_vm9, %v1616_v36 }
 0x1a2   : > { %2047 = shalt.err (!%p2044_p12)
}
 0x1a3   : > { %s2155_s29 = smov 256   ;;  %s2156_s6 = smov 512  }
 0x1a4   : > { %s2157_s7 = smov 16  }
 0x1a5   : > { %1890 = dma.vmem_to_hbm [thread:$0]  (%p2216_p5), %s1639_s25, 1024, %s1641_s26, %s1626_s27, %s2155_s29, %s2156_s6, %s2157_s7  }
 0x1a6 PF: > { %s1655_s8 = sand.u32 1, %s2110_s9   ;;  %p1893_p13 = pnand %p1779_p10, %p2227_p9 }
 0x1a7   : > { %s1656_s15 = scalar_lea.sflag [#allocation9], %s1655_s8 }
 0x1a8   : > { %p1894_p0 = pneg %p1893_p13 }
 0x1aa   : > { %2105 = dma.done.wait (%p1894_p0), %s1656_s15, 1024  }
 0x1ab   : > { %2107 = vsyncadd (%p1894_p0), %s1656_s15, 4294966272  ;;  %s15_s14 = sadd.s32 1, %s2130_s14   ;;  %s4045_s9 = smov %s2114_s10 }
 0x1ac   : > { %p12_p1 = scmp.ge.s32.totalorder %s15_s14, 4   ;;  %s4046_s10 = smov %s2118_s11 }
 0x1ad   : > { %s4047_s11 = smov %s2225_s22  ;;  %s4048_s12 = smov %s2126_s13 }
 0x1ae   : > { %s4049_s13 = smov %s4051_s17  ;;  %14 = sbr.rel (!%p12_p1) target bundleno = 4 (0x4), region = 181 }
 0x1b3   :  { %1662 = vsyncpa [#allocation9], 1 }
 0x1b4   :  { %1664 = vsyncpa [#allocation9 + $0x1], 1 }

</bundles_post_ra>
